<compile_context>
chip_gen: v6e
topology: v6e:2x2x1
jax: 0.10.0
libtpu: 0.0.40
codegen_flags: <defaults>
</compile_context>

<pallas_src>
import functools

import jax
import jax.numpy as jnp
from jax.experimental import pallas as pl
from jax.experimental.pallas import tpu as pltpu


def _round_up(n, m):
    return ((n + m - 1) // m) * m


def _fold_bn(h_sum, h_sumsq, gamma, beta, inv_n, eps):
    """Fold BN into (scale, shift) so that BN(h) == h * scale + shift."""
    mean = h_sum * inv_n
    var = h_sumsq * inv_n - mean * mean            # biased (torch training) var
    scale = gamma * jax.lax.rsqrt(var + eps)
    shift = beta - mean * scale
    return scale, shift


# ---------------------------------------------------------------------------
# Fast path: whole (padded) batch VMEM-resident, single kernel invocation.
# ---------------------------------------------------------------------------
def _mlp_small_kernel(x_ref, w1_ref, b1_ref, g1_ref, be1_ref,
                      w2_ref, b2_ref, g2_ref, be2_ref, w3_ref, b3_ref,
                      out_ref, *, batch_size, padded_batch, eps=1e-5):
    inv_n = 1.0 / float(batch_size)

    # Padded-tail row mask -- only built when padding exists (trace-time check).
    if padded_batch != batch_size:
        rid = jax.lax.broadcasted_iota(jnp.int32, (padded_batch, 1), 0)
        mask = (rid < batch_size).astype(jnp.float32)
    else:
        mask = None

    def stats(h):
        hm = h * mask if mask is not None else h
        return (jnp.sum(hm, axis=0, keepdims=True),
                jnp.sum(hm * hm, axis=0, keepdims=True))

    # fc1 + BN1 + ReLU
    h1 = jnp.dot(x_ref[...], w1_ref[...],
                 preferred_element_type=jnp.float32) + b1_ref[...]
    s1, t1 = _fold_bn(*stats(h1), g1_ref[...], be1_ref[...], inv_n, eps)
    a1 = jnp.maximum(h1 * s1 + t1, 0.0)

    # fc2 + BN2 + ReLU
    h2 = jnp.dot(a1.astype(jnp.bfloat16), w2_ref[...],
                 preferred_element_type=jnp.float32) + b2_ref[...]
    s2, t2 = _fold_bn(*stats(h2), g2_ref[...], be2_ref[...], inv_n, eps)
    a2 = jnp.maximum(h2 * s2 + t2, 0.0)

    # fc6 + sigmoid: contract a2's feature axis directly so the result is a
    # lane-dense (1, padded_batch) row (no materialized transpose).
    z = jax.lax.dot_general(w3_ref[...], a2,
                            dimension_numbers=(((1,), (1,)), ((), ())),
                            preferred_element_type=jnp.float32) + b3_ref[...]
    out_ref[...] = jax.nn.sigmoid(z)


# ---------------------------------------------------------------------------
# Tiled 3-phase path: training-mode BN needs full-batch statistics.
#   phase 0: fc1, accumulate layer-1 sum / sumsq          (x streamed)
#   phase 1: fold BN1, fc2, accumulate layer-2 sum / sumsq
#   phase 2: fold BN2, fc6 + sigmoid, lane-dense output
# When cache_acts, h1/h2 live in persistent VMEM scratch so x is read once.
# ---------------------------------------------------------------------------
def _mlp_tiled_kernel(x_ref,
                      w1_ref, b1_ref, g1_ref, be1_ref,
                      w2_ref, b2_ref, g2_ref, be2_ref,
                      w3_ref, b3_ref,
                      out_ref,
                      sum1, sumsq1, sum2, sumsq2,
                      s1_ref, t1_ref, s2_ref, t2_ref,
                      *cache_refs,
                      batch_size, tile_b, cache_acts, eps=1e-5):
    phase = pl.program_id(0)            # 0: BN1 stats, 1: BN2 stats, 2: output
    i = pl.program_id(1)                # batch-tile index
    inv_n = 1.0 / float(batch_size)
    need_mask = (batch_size % tile_b) != 0          # trace-time check

    if cache_acts:
        h1_cache, h2_cache = cache_refs
        row0 = pl.multiple_of(i * tile_b, tile_b)   # row offset of this tile

    def row_mask():
        # (tile_b, 1): 1.0 for real rows, 0.0 for the zero-padded batch tail
        # (padded rows would otherwise contribute b1/b2 to the statistics).
        rid = jax.lax.broadcasted_iota(jnp.int32, (tile_b, 1), 0) + i * tile_b
        return (rid < batch_size).astype(jnp.float32)

    def accumulate(h, sum_ref, sumsq_ref):
        hm = h * row_mask() if need_mask else h
        sum_ref[...] += jnp.sum(hm, axis=0, keepdims=True)
        sumsq_ref[...] += jnp.sum(hm * hm, axis=0, keepdims=True)

    def fc1():
        return jnp.dot(x_ref[...], w1_ref[...],
                       preferred_element_type=jnp.float32) + b1_ref[...]

    def fc2(a1):
        return jnp.dot(a1.astype(jnp.bfloat16), w2_ref[...],
                       preferred_element_type=jnp.float32) + b2_ref[...]

    def bn_relu(h, s_ref, t_ref):       # folded BN -> one FMA + ReLU
        return jnp.maximum(h * s_ref[...] + t_ref[...], 0.0)

    # ---------------- phase 0: fc1 + layer-1 batch statistics ----------------
    @pl.when(phase == 0)
    def _():
        @pl.when(i == 0)
        def _():
            sum1[...] = jnp.zeros_like(sum1)
            sumsq1[...] = jnp.zeros_like(sumsq1)

        h1 = fc1()
        if cache_acts:
            h1_cache[pl.ds(row0, tile_b), :] = h1
        accumulate(h1, sum1, sumsq1)

    # -------- phase 1: fold BN1, fc2 + layer-2 batch statistics --------------
    @pl.when(phase == 1)
    def _():
        @pl.when(i == 0)
        def _():
            s, t = _fold_bn(sum1[...], sumsq1[...], g1_ref[...], be1_ref[...],
                            inv_n, eps)
            s1_ref[...] = s
            t1_ref[...] = t
            sum2[...] = jnp.zeros_like(sum2)
            sumsq2[...] = jnp.zeros_like(sumsq2)

        h1 = h1_cache[pl.ds(row0, tile_b), :] if cache_acts else fc1()
        h2 = fc2(bn_relu(h1, s1_ref, t1_ref))
        if cache_acts:
            h2_cache[pl.ds(row0, tile_b), :] = h2
        accumulate(h2, sum2, sumsq2)

    # -------- phase 2: fold BN2, fc6 + sigmoid, lane-dense output ------------
    @pl.when(phase == 2)
    def _():
        @pl.when(i == 0)
        def _():
            s, t = _fold_bn(sum2[...], sumsq2[...], g2_ref[...], be2_ref[...],
                            inv_n, eps)
            s2_ref[...] = s
            t2_ref[...] = t

        if cache_acts:
            h2 = h2_cache[pl.ds(row0, tile_b), :]
        else:
            h2 = fc2(bn_relu(fc1(), s1_ref, t1_ref))
        a2 = bn_relu(h2, s2_ref, t2_ref)                       # (tile_b, 32)
        # Contract a2's feature axis directly -> lane-dense (1, tile_b) result
        # (no lane-width-1 masked stores, no materialized transpose).
        z = jax.lax.dot_general(w3_ref[...], a2,
                                dimension_numbers=(((1,), (1,)), ((), ())),
                                preferred_element_type=jnp.float32) + b3_ref[...]
        out_ref[...] = jax.nn.sigmoid(z).reshape(1, 1, tile_b)


# ---------------------------------------------------------------------------
# Wrapper / dispatch.
# ---------------------------------------------------------------------------
def mlp_forward(x, params, *, tile_b=None, force_tiled=False):
    """x: (B, D_in) float32.  Returns (B,) float32 (torch `.squeeze()` on (B,1))."""
    B, D_in = x.shape
    (w1, b1, g1, be1, w2, b2, g2, be2, w3, b3) = params

    w1b = w1.astype(jnp.bfloat16)
    w2b = w2.astype(jnp.bfloat16)

    def cast_pad(n_rows):
        xp = x if n_rows == B else jnp.pad(x, ((0, n_rows - B), (0, 0)))
        return xp.astype(jnp.bfloat16)       # halves dominant HBM read traffic

    def cost(n_rows, x_reads):
        flops = n_rows * (2 * D_in * 64 + 2 * 64 * 32 + 2 * 32 + 6 * 64 + 6 * 32)
        nbytes = (x_reads * n_rows * D_in * 2 + n_rows * 4
                  + 2 * (D_in * 64 + 64 * 32) + 4 * (4 * 64 + 4 * 32 + 33))
        return pl.CostEstimate(flops=int(flops), transcendentals=int(n_rows + 96),
                               bytes_accessed=int(nbytes))

    B128 = _round_up(B, 128)                 # 128-multiple => lane-dense output

    # ---------------- fast path: single invocation, whole batch in VMEM ------
    fast_vmem_est = B128 * (_round_up(D_in, 128) * 2 + 2048) + (1 << 20)
    if not force_tiled and fast_vmem_est <= (12 << 20):
        kernel = functools.partial(_mlp_small_kernel,
                                   batch_size=B, padded_batch=B128)
        out = pl.pallas_call(
            kernel,
            out_shape=jax.ShapeDtypeStruct((1, B128), jnp.float32),
            compiler_params=pltpu.CompilerParams(vmem_limit_bytes=32 << 20),
            cost_estimate=cost(B128, 1),
        )(cast_pad(B128), w1b, b1, g1, be1, w2b, b2, g2, be2, w3, b3)
        return out.reshape(B128)[:B]

    # ---------------- tiled 3-phase path --------------------------------------
    if tile_b is None:
        # Target >= ~0.5 MiB per x DMA (HBM-roofline fraction grows sharply
        # with tile size), capped at 4096 rows.
        tile_b = min(4096, max(1024,
                               _round_up((512 * 1024) // max(2 * D_in, 1), 128)))
    tb = min(_round_up(tile_b, 128), B128)
    B_pad = _round_up(B, tb)
    nt = B_pad // tb

    # Cache h1/h2 in persistent VMEM scratch when they fit (x streamed once);
    # otherwise fall back to re-streaming x and recomputing fc1/fc2 per phase.
    cache_vmem = B_pad * (128 + 128) * 4     # f32 caches, lane-padded to 128
    cache_acts = cache_vmem <= (24 << 20)

    est = (2 * tb * _round_up(D_in, 128) * 2     # double-buffered x tile (bf16)
           + 2 * tb * 4                          # double-buffered out tile
           + (cache_vmem if cache_acts else 0)
           + (2 << 20))                          # weights + small scratch
    vmem_limit = int(min(max(est + (6 << 20), 32 << 20), 48 << 20))

    if cache_acts:
        # x is only needed in phase 0; pin the block to the last tile afterwards
        # so no further x DMAs are issued in phases 1/2.
        x_map = lambda p, i: (jnp.where(p == 0, i, nt - 1), 0)
    else:
        x_map = lambda p, i: (i, 0)

    def full(a):
        return pl.BlockSpec(a.shape, lambda p, i, _n=a.ndim: (0,) * _n)

    scratch = [pltpu.VMEM((1, 64), jnp.float32),   # sum1
               pltpu.VMEM((1, 64), jnp.float32),   # sumsq1
               pltpu.VMEM((1, 32), jnp.float32),   # sum2
               pltpu.VMEM((1, 32), jnp.float32),   # sumsq2
               pltpu.VMEM((1, 64), jnp.float32),   # folded BN1 scale
               pltpu.VMEM((1, 64), jnp.float32),   # folded BN1 shift
               pltpu.VMEM((1, 32), jnp.float32),   # folded BN2 scale
               pltpu.VMEM((1, 32), jnp.float32)]   # folded BN2 shift
    if cache_acts:
        scratch += [pltpu.VMEM((B_pad, 64), jnp.float32),   # h1 cache
                    pltpu.VMEM((B_pad, 32), jnp.float32)]   # h2 cache

    kernel = functools.partial(_mlp_tiled_kernel, batch_size=B, tile_b=tb,
                               cache_acts=cache_acts)

    out = pl.pallas_call(
        kernel,
        out_shape=jax.ShapeDtypeStruct((nt, 1, tb), jnp.float32),
        grid=(3, nt),
        in_specs=[pl.BlockSpec((tb, D_in), x_map),
                  full(w1b), full(b1), full(g1), full(be1),
                  full(w2b), full(b2), full(g2), full(be2),
                  full(w3), full(b3)],
        # Output block pinned to 0 in phases 0/1 -> each tile is written back to
        # HBM exactly once (during phase 2), never with uninitialized contents.
        out_specs=pl.BlockSpec((1, 1, tb),
                               lambda p, i: (jnp.where(p == 2, i, 0), 0, 0)),
        scratch_shapes=scratch,
        compiler_params=pltpu.CompilerParams(
            # Both axes sequential: phases are ordered and the batch axis is a
            # reduction axis for the BN statistics (see v7x TODO above).
            dimension_semantics=("arbitrary", "arbitrary"),
            vmem_limit_bytes=vmem_limit),
        cost_estimate=cost(B_pad, 1 if cache_acts else 3),
    )(cast_pad(B_pad), w1b, b1, g1, be1, w2b, b2, g2, be2, w3, b3)

    return out.reshape(nt * tb)[:B]


# ---------------------------------------------------------------------------
# Pure-JAX f32 reference (torch training-mode BN semantics) and init.
# ---------------------------------------------------------------------------
def reference_forward(x, params, eps=1e-5):
    (w1, b1, g1, be1, w2, b2, g2, be2, w3, b3) = params

    def bn(h, g, b):
        m = jnp.mean(h, axis=0, keepdims=True)
        v = jnp.mean((h - m) ** 2, axis=0, keepdims=True)      # biased variance
        return (h - m) * jax.lax.rsqrt(v + eps) * g + b

    a1 = jnp.maximum(bn(x @ w1 + b1, g1, be1), 0.0)
    a2 = jnp.maximum(bn(a1 @ w2 + b2, g2, be2), 0.0)
    z = a2 @ w3.T + b3                                          # (B, 1)
    return jnp.squeeze(jax.nn.sigmoid(z))


def init_params(key, input_size):
    """Deterministic init matching the torch module's shapes.
    Linear weights stored (in, out); fc6 weight stored as a (1, 32) row."""
    ks = jax.random.split(key, 6)

    def linear(kw, kb, fan_in, fan_out):
        bound = 1.0 / jnp.sqrt(fan_in)
        w = jax.random.uniform(kw, (fan_in, fan_out), jnp.float32, -bound, bound)
        b = jax.random.uniform(kb, (1, fan_out), jnp.float32, -bound, bound)
        return w, b

    w1, b1 = linear(ks[0], ks[1], input_size, 64)
    w2, b2 = linear(ks[2], ks[3], 64, 32)
    w3c, b3 = linear(ks[4], ks[5], 32, 1)
    w3 = w3c.T                                    # (1, 32) row for the kernel

    # BatchNorm1d default init: weight=1, bias=0
    g1, be1 = jnp.ones((1, 64), jnp.float32), jnp.zeros((1, 64), jnp.float32)
    g2, be2 = jnp.ones((1, 32), jnp.float32), jnp.zeros((1, 32), jnp.float32)

    return (w1, b1, g1, be1, w2, b2, g2, be2, w3, b3)


if __name__ == "__main__":
    key = jax.random.PRNGKey(0)
    k_x, k_p = jax.random.split(key)

    B, D_in = 200, 32
    x = jax.random.normal(k_x, (B, D_in), jnp.float32)
    params = init_params(k_p, D_in)
    y_ref = reference_forward(x, params)

    # 1) Fast path: single invocation, whole padded batch VMEM-resident.
    y_fast = mlp_forward(x, params)
    jax.block_until_ready(y_fast)
    assert y_fast.shape == (B,), y_fast.shape
    assert bool(jnp.all(jnp.isfinite(y_fast)))
    assert bool(jnp.all((y_fast >= 0.0) & (y_fast <= 1.0)))
    err_fast = float(jnp.max(jnp.abs(y_fast - y_ref)))
    assert err_fast < 5e-2, f"fast path max abs err: {err_fast}"

    # 2) Tiled 3-phase path (forced): multi-tile grid, tail masking, VMEM
    #    activation caches, phase-gated output writeback.
    y_tiled = mlp_forward(x, params, tile_b=128, force_tiled=True)
    jax.block_until_ready(y_tiled)
    assert y_tiled.shape == (B,), y_tiled.shape
    assert bool(jnp.all(jnp.isfinite(y_tiled)))
    assert bool(jnp.all((y_tiled >= 0.0) & (y_tiled <= 1.0)))
    err_tiled = float(jnp.max(jnp.abs(y_tiled - y_ref)))
    assert err_tiled < 5e-2, f"tiled path max abs err: {err_tiled}"

    print("KERNEL_OK")
</pallas_src>

<mosaic_0001>
module attributes {stable_mosaic.version = 11 : i64} {
  func.func @_mlp_small_kernel(%arg0: memref<256x32xbf16, #tpu.memory_space<vmem>>, %arg1: memref<32x64xbf16, #tpu.memory_space<vmem>>, %arg2: memref<1x64xf32, #tpu.memory_space<vmem>>, %arg3: memref<1x64xf32, #tpu.memory_space<vmem>>, %arg4: memref<1x64xf32, #tpu.memory_space<vmem>>, %arg5: memref<64x32xbf16, #tpu.memory_space<vmem>>, %arg6: memref<1x32xf32, #tpu.memory_space<vmem>>, %arg7: memref<1x32xf32, #tpu.memory_space<vmem>>, %arg8: memref<1x32xf32, #tpu.memory_space<vmem>>, %arg9: memref<1x32xf32, #tpu.memory_space<vmem>>, %arg10: memref<1x1xf32, #tpu.memory_space<vmem>>, %arg11: memref<1x256xf32, #tpu.memory_space<vmem>>) attributes {dimension_semantics = [], scalar_prefetch = 0 : i64, scratch_operands = 0 : i64, tpu.core_type = #tpu.core_type<tc>} {
    %0 = tpu.iota {dimensions = array<i32: 0>} : vector<256x1xi32>
    %c200_i32 = arith.constant 200 : i32
    %1 = vector.broadcast %c200_i32 : i32 to vector<256x1xi32>
    %2 = arith.cmpi slt, %0, %1 : vector<256x1xi32>
    %3 = arith.extui %2 : vector<256x1xi1> to vector<256x1xi32>
    %4 = arith.sitofp %3 : vector<256x1xi32> to vector<256x1xf32>
    %c0 = arith.constant 0 : index
    %c0_0 = arith.constant 0 : index
    %5 = vector.load %arg0[%c0, %c0_0] : memref<256x32xbf16, #tpu.memory_space<vmem>>, vector<256x32xbf16>
    %c0_1 = arith.constant 0 : index
    %c0_2 = arith.constant 0 : index
    %6 = vector.load %arg1[%c0_1, %c0_2] : memref<32x64xbf16, #tpu.memory_space<vmem>>, vector<32x64xbf16>
    %cst = arith.constant dense<0.000000e+00> : vector<256x64xf32>
    %7 = tpu.matmul %5, %6, %cst {dimension_numbers = #tpu.dot_dimension_numbers<[1], [0], [0], [1], [0, 0, 1, 1], [], []>} : vector<256x32xbf16>, vector<32x64xbf16>, vector<256x64xf32> -> vector<256x64xf32>
    %c0_3 = arith.constant 0 : index
    %c0_4 = arith.constant 0 : index
    %8 = vector.load %arg2[%c0_3, %c0_4] : memref<1x64xf32, #tpu.memory_space<vmem>>, vector<1x64xf32>
    %9 = vector.broadcast %8 : vector<1x64xf32> to vector<256x64xf32>
    %10 = arith.addf %7, %9 : vector<256x64xf32>
    %11 = vector.broadcast %4 : vector<256x1xf32> to vector<256x64xf32>
    %12 = arith.mulf %10, %11 : vector<256x64xf32>
    %cst_5 = arith.constant dense<0.000000e+00> : vector<64xf32>
    %13 = vector.multi_reduction <add>, %12, %cst_5 [0] : vector<256x64xf32> to vector<64xf32>
    %14 = vector.shape_cast %13 : vector<64xf32> to vector<1x64xf32>
    %15 = arith.mulf %12, %12 : vector<256x64xf32>
    %cst_6 = arith.constant dense<0.000000e+00> : vector<64xf32>
    %16 = vector.multi_reduction <add>, %15, %cst_6 [0] : vector<256x64xf32> to vector<64xf32>
    %17 = vector.shape_cast %16 : vector<64xf32> to vector<1x64xf32>
    %c0_7 = arith.constant 0 : index
    %c0_8 = arith.constant 0 : index
    %18 = vector.load %arg3[%c0_7, %c0_8] : memref<1x64xf32, #tpu.memory_space<vmem>>, vector<1x64xf32>
    %c0_9 = arith.constant 0 : index
    %c0_10 = arith.constant 0 : index
    %19 = vector.load %arg4[%c0_9, %c0_10] : memref<1x64xf32, #tpu.memory_space<vmem>>, vector<1x64xf32>
    %cst_11 = arith.constant 5.000000e-03 : f32
    %20 = vector.broadcast %cst_11 : f32 to vector<1x64xf32>
    %21 = arith.mulf %14, %20 : vector<1x64xf32>
    %cst_12 = arith.constant 5.000000e-03 : f32
    %22 = vector.broadcast %cst_12 : f32 to vector<1x64xf32>
    %23 = arith.mulf %17, %22 : vector<1x64xf32>
    %24 = arith.mulf %21, %21 : vector<1x64xf32>
    %25 = arith.subf %23, %24 : vector<1x64xf32>
    %cst_13 = arith.constant 9.99999974E-6 : f32
    %26 = vector.broadcast %cst_13 : f32 to vector<1x64xf32>
    %27 = arith.addf %25, %26 : vector<1x64xf32>
    %28 = math.rsqrt %27 : vector<1x64xf32>
    %29 = arith.mulf %18, %28 : vector<1x64xf32>
    %30 = arith.mulf %21, %29 : vector<1x64xf32>
    %31 = arith.subf %19, %30 : vector<1x64xf32>
    %32 = vector.broadcast %29 : vector<1x64xf32> to vector<256x64xf32>
    %33 = arith.mulf %10, %32 : vector<256x64xf32>
    %34 = vector.broadcast %31 : vector<1x64xf32> to vector<256x64xf32>
    %35 = arith.addf %33, %34 : vector<256x64xf32>
    %cst_14 = arith.constant 0.000000e+00 : f32
    %36 = vector.broadcast %cst_14 : f32 to vector<256x64xf32>
    %37 = arith.maximumf %35, %36 : vector<256x64xf32>
    %38 = arith.truncf %37 : vector<256x64xf32> to vector<256x64xbf16>
    %c0_15 = arith.constant 0 : index
    %c0_16 = arith.constant 0 : index
    %39 = vector.load %arg5[%c0_15, %c0_16] : memref<64x32xbf16, #tpu.memory_space<vmem>>, vector<64x32xbf16>
    %cst_17 = arith.constant dense<0.000000e+00> : vector<256x32xf32>
    %40 = tpu.matmul %38, %39, %cst_17 {dimension_numbers = #tpu.dot_dimension_numbers<[1], [0], [0], [1], [0, 0, 1, 1], [], []>} : vector<256x64xbf16>, vector<64x32xbf16>, vector<256x32xf32> -> vector<256x32xf32>
    %c0_18 = arith.constant 0 : index
    %c0_19 = arith.constant 0 : index
    %41 = vector.load %arg6[%c0_18, %c0_19] : memref<1x32xf32, #tpu.memory_space<vmem>>, vector<1x32xf32>
    %42 = vector.broadcast %41 : vector<1x32xf32> to vector<256x32xf32>
    %43 = arith.addf %40, %42 : vector<256x32xf32>
    %44 = vector.broadcast %4 : vector<256x1xf32> to vector<256x32xf32>
    %45 = arith.mulf %43, %44 : vector<256x32xf32>
    %cst_20 = arith.constant dense<0.000000e+00> : vector<32xf32>
    %46 = vector.multi_reduction <add>, %45, %cst_20 [0] : vector<256x32xf32> to vector<32xf32>
    %47 = vector.shape_cast %46 : vector<32xf32> to vector<1x32xf32>
    %48 = arith.mulf %45, %45 : vector<256x32xf32>
    %cst_21 = arith.constant dense<0.000000e+00> : vector<32xf32>
    %49 = vector.multi_reduction <add>, %48, %cst_21 [0] : vector<256x32xf32> to vector<32xf32>
    %50 = vector.shape_cast %49 : vector<32xf32> to vector<1x32xf32>
    %c0_22 = arith.constant 0 : index
    %c0_23 = arith.constant 0 : index
    %51 = vector.load %arg7[%c0_22, %c0_23] : memref<1x32xf32, #tpu.memory_space<vmem>>, vector<1x32xf32>
    %c0_24 = arith.constant 0 : index
    %c0_25 = arith.constant 0 : index
    %52 = vector.load %arg8[%c0_24, %c0_25] : memref<1x32xf32, #tpu.memory_space<vmem>>, vector<1x32xf32>
    %cst_26 = arith.constant 5.000000e-03 : f32
    %53 = vector.broadcast %cst_26 : f32 to vector<1x32xf32>
    %54 = arith.mulf %47, %53 : vector<1x32xf32>
    %cst_27 = arith.constant 5.000000e-03 : f32
    %55 = vector.broadcast %cst_27 : f32 to vector<1x32xf32>
    %56 = arith.mulf %50, %55 : vector<1x32xf32>
    %57 = arith.mulf %54, %54 : vector<1x32xf32>
    %58 = arith.subf %56, %57 : vector<1x32xf32>
    %cst_28 = arith.constant 9.99999974E-6 : f32
    %59 = vector.broadcast %cst_28 : f32 to vector<1x32xf32>
    %60 = arith.addf %58, %59 : vector<1x32xf32>
    %61 = math.rsqrt %60 : vector<1x32xf32>
    %62 = arith.mulf %51, %61 : vector<1x32xf32>
    %63 = arith.mulf %54, %62 : vector<1x32xf32>
    %64 = arith.subf %52, %63 : vector<1x32xf32>
    %65 = vector.broadcast %62 : vector<1x32xf32> to vector<256x32xf32>
    %66 = arith.mulf %43, %65 : vector<256x32xf32>
    %67 = vector.broadcast %64 : vector<1x32xf32> to vector<256x32xf32>
    %68 = arith.addf %66, %67 : vector<256x32xf32>
    %cst_29 = arith.constant 0.000000e+00 : f32
    %69 = vector.broadcast %cst_29 : f32 to vector<256x32xf32>
    %70 = arith.maximumf %68, %69 : vector<256x32xf32>
    %c0_30 = arith.constant 0 : index
    %c0_31 = arith.constant 0 : index
    %71 = vector.load %arg9[%c0_30, %c0_31] : memref<1x32xf32, #tpu.memory_space<vmem>>, vector<1x32xf32>
    %cst_32 = arith.constant dense<0.000000e+00> : vector<1x256xf32>
    %72 = tpu.matmul %71, %70, %cst_32 {dimension_numbers = #tpu.dot_dimension_numbers<[1], [1], [0], [0], [0, 0, 1, 0], [], []>} : vector<1x32xf32>, vector<256x32xf32>, vector<1x256xf32> -> vector<1x256xf32>
    %c0_33 = arith.constant 0 : index
    %c0_34 = arith.constant 0 : index
    %73 = vector.load %arg10[%c0_33, %c0_34] : memref<1x1xf32, #tpu.memory_space<vmem>>, vector<1x1xf32>
    %74 = vector.broadcast %73 : vector<1x1xf32> to vector<1x256xf32>
    %75 = arith.addf %72, %74 : vector<1x256xf32>
    %76 = arith.negf %75 : vector<1x256xf32>
    %77 = math.exp %76 : vector<1x256xf32>
    %cst_35 = arith.constant 1.000000e+00 : f32
    %78 = vector.broadcast %cst_35 : f32 to vector<1x256xf32>
    %79 = arith.addf %78, %77 : vector<1x256xf32>
    %80 = arith.divf %78, %79 : vector<1x256xf32>
    %c0_36 = arith.constant 0 : index
    %c0_37 = arith.constant 0 : index
    %81 = vector.load %arg11[%c0_36, %c0_37] : memref<1x256xf32, #tpu.memory_space<vmem>>, vector<1x256xf32>
    tpu.vector_store %arg11[%c0_36, %c0_37], %80 {strides = array<i32>} : memref<1x256xf32, #tpu.memory_space<vmem>>, vector<1x256xf32>,
    return
  }
}

</mosaic_0001>

<bundles_post_ra>
// kernel: tpu_custom_call.1
= control target key start
LH: loop header
LB: loop body
LE: loop exit
PB: predicated region body
PF: predicated region fallthrough
CT: control target
= control target key end

     0   :  { %s2881_s0 = inlined_call_operand.vmem [shape: bf16[256,32], index: 0, kind: input, shape index: {}]   ;;  %s2882_s1 = inlined_call_operand.vmem [shape: bf16[32,64], index: 1, kind: input, shape index: {}]   ;;  %s2883_s2 = inlined_call_operand.vmem [shape: f32[1,64], index: 2, kind: input, shape index: {}]   ;;  %s2884_s3 = inlined_call_operand.vmem [shape: f32[1,64], index: 3, kind: input, shape index: {}]   ;;  %s2885_s4 = inlined_call_operand.vmem [shape: f32[1,64], index: 4, kind: input, shape index: {}]   ;;  %s2886_s5 = inlined_call_operand.vmem [shape: bf16[64,32], index: 5, kind: input, shape index: {}]   ;;  %s2887_s6 = inlined_call_operand.vmem [shape: f32[1,32], index: 6, kind: input, shape index: {}]   ;;  %s2888_s7 = inlined_call_operand.vmem [shape: f32[1,32], index: 7, kind: input, shape index: {}]   ;;  %s2889_s8 = inlined_call_operand.vmem [shape: f32[1,32], index: 8, kind: input, shape index: {}]   ;;  %s2890_s9 = inlined_call_operand.vmem [shape: f32[1,32], index: 9, kind: input, shape index: {}]   ;;  %s2891_s10 = inlined_call_operand.<no memory space> [shape: f32[1,1], index: 10, kind: input, shape index: {}]   ;;  %s2892_s11 = inlined_call_operand.hbm [shape: f32[1,256], index: 11, kind: output, shape index: {}]  }
   0x1   :  { %v16_v0 = vstv %s2891_s10 }
   0x2   :  { %17 = vst [vmem:[#allocation2] sm:$0x1] %v16_v0 }
   0x3   :  { %v1896_v1 = vld [vmem:[%s2882_s1 + $0x8] sm:$0xff]   ;;  %v1897_v2 = vld [vmem:[%s2882_s1] sm:$0xff]   ;;  %vm306_vm0 = vcmask 261120   ;;  %v1900_v5 = vld [vmem:[%s2881_s0 + $0x10] sm:$0xff]  }
   0x4   :  { %1816 = vmatprep.subr.bf16.mxu0 %v1896_v1  ;;  %v1898_v3 = vld [vmem:[%s2881_s0] sm:$0xff]   ;;  %v1899_v4 = vld [vmem:[%s2881_s0 + $0x8] sm:$0xff]   ;;  %v1901_v6 = vld [vmem:[%s2881_s0 + $0x18] sm:$0xff]  }
   0x5   :  { %1817 = vmatpush3.bf16.msra.mxu0 %v1896_v1  ;;  %1820 = vmatprep.mubr.msk.bf16.mxu0 %vm306_vm0, %v1898_v3  ;;  %v1902_v7 = vld [vmem:[%s2881_s0 + $0x20] sm:$0xff]  }
   0x6   :  { %1818 = vmatprep.subr.bf16.mxu0 %v1897_v2 }
   0x9   :  { %1819 = vmatpush3.bf16.msra.mxu0 %v1897_v2 }
   0xc   :  { %1821 = vmatmul.mubr.msk.bf16.vlgmr.msra.gmra.mxu0 %vm306_vm0, %v1899_v4 }
   0xd   :  { %1824 = vmatprep.mubr.msk.bf16.mxu0 %vm306_vm0, %v1900_v5 }
  0x14   :  { %1825 = vmatmul.mubr.msk.bf16.gmra.mxu0 %vm306_vm0, %v1901_v6 }
  0x15   :  { %1828 = vmatprep.mubr.msk.bf16.mxu0 %vm306_vm0, %v1902_v7 }
  0x16   :  { %18 = vsyncpa [#allocation4], 0  ;;  %v1903_v8 = vld [vmem:[%s2881_s0 + $0x28] sm:$0xff]   ;;  %v1904_v9 = vld [vmem:[%s2881_s0 + $0x30] sm:$0xff]   ;;  %vm548_vm1 = vcmask 523264  }
  0x17   :  { %v1905_v10 = vld [vmem:[%s2881_s0 + $0x38] sm:$0xff]   ;;  %v1906_v11 = vld [vmem:[%s2881_s0 + $0x40] sm:$0xff]   ;;  %v1907_v12 = vld [vmem:[%s2881_s0 + $0x48] sm:$0xff]  }
  0x18   :  { %v1908_v13 = vld [vmem:[%s2881_s0 + $0x50] sm:$0xff]   ;;  %v1909_v14 = vld [vmem:[%s2881_s0 + $0x58] sm:$0xff]   ;;  %v1910_v15 = vld [vmem:[%s2881_s0 + $0x60] sm:$0xff]  }
  0x19   :  { %v1911_v16 = vld [vmem:[%s2881_s0 + $0x68] sm:$0xff]   ;;  %v1912_v17 = vld [vmem:[%s2881_s0 + $0x70] sm:$0xff]   ;;  %v1913_v18 = vld [vmem:[%s2881_s0 + $0x78] sm:$0xff]  }
  0x1a   :  { %v1914_v19 = vld [vmem:[%s2886_s5 + $0x18] sm:$0xff]   ;;  %v1915_v20 = vld [vmem:[%s2886_s5 + $0x10] sm:$0xff]   ;;  %v2097_v22 = vld [vmem:[%s2883_s2] ss:$0 sm:$0xff] }
  0x1b   :  { %1852 = vmatprep.subr.bf16.mxu1 %v1914_v19  ;;  %v1916_v24 = vld [vmem:[%s2886_s5 + $0x8] sm:$0xff]   ;;  %v1917_v29 = vld [vmem:[%s2886_s5] sm:$0xff]  }
  0x1c   :  { %1829 = vmatmul.mubr.msk.bf16.gmra.mxu0 %vm306_vm0, %v1903_v8  ;;  %1853 = vmatpush3.bf16.msra.mxu1 %v1914_v19 }
  0x1d   :  { %1832 = vmatprep.mubr.msk.bf16.mxu0 %vm306_vm0, %v1904_v9  ;;  %1854 = vmatprep.subr.bf16.mxu1 %v1915_v20 }
  0x20   :  { %1855 = vmatpush3.bf16.msra.mxu1 %v1915_v20 }
  0x21   :  { %1856 = vmatprep.subr.bf16.mxu1 %v1916_v24 }
  0x24   :  { %1833 = vmatmul.mubr.msk.bf16.gmra.mxu0 %vm306_vm0, %v1905_v10  ;;  %1857 = vmatpush3.bf16.msra.mxu1 %v1916_v24 }
  0x25   :  { %1836 = vmatprep.mubr.msk.bf16.mxu0 %vm306_vm0, %v1906_v11  ;;  %1858 = vmatprep.subr.bf16.mxu1 %v1917_v29 }
  0x28   :  { %1859 = vmatpush3.bf16.msra.mxu1 %v1917_v29 }
  0x2c   :  { %1837 = vmatmul.mubr.msk.bf16.gmra.mxu0 %vm306_vm0, %v1907_v12 }
  0x2d   :  { %1840 = vmatprep.mubr.msk.bf16.mxu0 %vm306_vm0, %v1908_v13 }
  0x34   :  { %1841 = vmatmul.mubr.msk.bf16.gmra.mxu0 %vm306_vm0, %v1909_v14 }
  0x35   :  { %1844 = vmatprep.mubr.msk.bf16.mxu0 %vm306_vm0, %v1910_v15 }
  0x3c   :  { %1845 = vmatmul.mubr.msk.bf16.gmra.mxu0 %vm306_vm0, %v1911_v16 }
  0x3d   :  { %1848 = vmatprep.mubr.msk.bf16.mxu0 %vm306_vm0, %v1912_v17 }
  0x44   :  { %1849 = vmatmul.mubr.msk.bf16.gmra.mxu0 %vm306_vm0, %v1913_v18 }
  0xcc   :  { %v1822_v21 = vpop.f32.mrf.mxu0 }
  0xcd   :  { %v2106_v27 = vadd.f32 %v1822_v21, %v2097_v22 }
  0xce   :  { %v389_v23 = vpop.f32.mrf.mxu0 }
  0xcf   :  { %v2103_v25 = vadd.f32 %v2097_v22, %v389_v23  ;;  %v620_v34 = vmul.f32 %v2106_v27, %v2106_v27  ;;  %v552_v38 = vsel %vm548_vm1, %v2106_v27, 0.0 }
  0xd0   :  { %v1823_v26 = vpop.f32.mrf.mxu0 }
  0xd1   :  { %v618_v30 = vmul.f32 %v2103_v25, %v2103_v25  ;;  %v2114_v31 = vadd.f32 %v1823_v26, %v2097_v22  ;;  %v549_v35 = vsel %vm548_vm1, %v2103_v25, 0.0  ;;  %v653_v48 = vsel %vm548_vm1, %v620_v34, 0.0 }
  0xd2   :  { %v392_v28 = vpop.f32.mrf.mxu0 }
  0xd3   :  { %v2117_v32 = vadd.f32 %v2097_v22, %v392_v28  ;;  %v650_v41 = vsel %vm548_vm1, %v618_v30, 0.0  ;;  %v621_v42 = vmul.f32 %v2114_v31, %v2114_v31  ;;  %v554_v49 = vsel %vm548_vm1, %v2114_v31, 0.0 }
  0xd4   :  { %v1826_v33 = vpop.f32.mrf.mxu0 }
  0xd5   :  { %v550_v36 = vsel %vm548_vm1, %v2117_v32, 0.0  ;;  %v619_v37 = vmul.f32 %v2117_v32, %v2117_v32  ;;  %v2140_v50 = vadd.f32 %v1826_v33, %v2097_v22  ;;  %v655_v55 = vsel %vm548_vm1, %v621_v42, 0.0 }
  0xd6   :  { %v551_v39 = vadd.f32 %v550_v36, %v549_v35  ;;  %v405_v40 = vpop.f32.mrf.mxu0 }
  0xd7   :  { %v651_v43 = vsel %vm548_vm1, %v619_v37, 0.0  ;;  %v2134_v44 = vadd.f32 %v2097_v22, %v405_v40  ;;  %v624_v62 = vmul.f32 %v2140_v50, %v2140_v50  ;;  %v560_v5 = vsel %vm548_vm1, %v2140_v50, 0.0 }
  0xd8   :  { %v553_v45 = vadd.f32 %v552_v38, %v551_v39  ;;  %v652_v46 = vadd.f32 %v651_v43, %v650_v41  ;;  %v1827_v47 = vpop.f32.mrf.mxu0 }
  0xd9   :  { %v622_v51 = vmul.f32 %v2134_v44, %v2134_v44  ;;  %v556_v56 = vsel %vm548_vm1, %v2134_v44, 0.0  ;;  %v2148_v57 = vadd.f32 %v1827_v47, %v2097_v22  ;;  %v661_v12 = vsel %vm548_vm1, %v624_v62, 0.0 }
  0xda   :  { %v654_v52 = vadd.f32 %v653_v48, %v652_v46  ;;  %v555_v53 = vadd.f32 %v554_v49, %v553_v45  ;;  %v408_v54 = vpop.f32.mrf.mxu0 }
  0xdb   :  { %v2151_v58 = vadd.f32 %v2097_v22, %v408_v54  ;;  %v657_v63 = vsel %vm548_vm1, %v622_v51, 0.0  ;;  %v625_v6 = vmul.f32 %v2148_v57, %v2148_v57  ;;  %v562_v13 = vsel %vm548_vm1, %v2148_v57, 0.0 }
  0xdc   :  { %v557_v59 = vadd.f32 %v556_v56, %v555_v53  ;;  %v656_v60 = vadd.f32 %v655_v55, %v654_v52  ;;  %v1830_v61 = vpop.f32.mrf.mxu0 }
  0xdd   :  { %v558_v0 = vsel %vm548_vm1, %v2151_v58, 0.0  ;;  %v623_v1 = vmul.f32 %v2151_v58, %v2151_v58  ;;  %v2172_v14 = vadd.f32 %v1830_v61, %v2097_v22  ;;  %v663_v19 = vsel %vm548_vm1, %v625_v6, 0.0 }
  0xde   :  { %v658_v2 = vadd.f32 %v657_v63, %v656_v60  ;;  %v559_v3 = vadd.f32 %v558_v0, %v557_v59  ;;  %v421_v4 = vpop.f32.mrf.mxu0 }
  0xdf   :  { %v659_v7 = vsel %vm548_vm1, %v623_v1, 0.0  ;;  %v2166_v8 = vadd.f32 %v2097_v22, %v421_v4  ;;  %v628_v29 = vmul.f32 %v2172_v14, %v2172_v14  ;;  %v568_v38 = vsel %vm548_vm1, %v2172_v14, 0.0 }
  0xe0   :  { %v561_v9 = vadd.f32 %v560_v5, %v559_v3  ;;  %v660_v10 = vadd.f32 %v659_v7, %v658_v2  ;;  %v1831_v11 = vpop.f32.mrf.mxu0 }
  0xe1   :  { %v626_v15 = vmul.f32 %v2166_v8, %v2166_v8  ;;  %v564_v20 = vsel %vm548_vm1, %v2166_v8, 0.0  ;;  %v2180_v21 = vadd.f32 %v1831_v11, %v2097_v22  ;;  %v669_v46 = vsel %vm548_vm1, %v628_v29, 0.0 }
  0xe2   :  { %v662_v16 = vadd.f32 %v661_v12, %v660_v10  ;;  %v563_v17 = vadd.f32 %v562_v13, %v561_v9  ;;  %v424_v18 = vpop.f32.mrf.mxu0 }
  0xe3   :  { %v2183_v23 = vadd.f32 %v2097_v22, %v424_v18  ;;  %v665_v30 = vsel %vm548_vm1, %v626_v15, 0.0  ;;  %v629_v39 = vmul.f32 %v2180_v21, %v2180_v21  ;;  %v570_v47 = vsel %vm548_vm1, %v2180_v21, 0.0 }
  0xe4   :  { %v565_v24 = vadd.f32 %v564_v20, %v563_v17  ;;  %v664_v26 = vadd.f32 %v663_v19, %v662_v16  ;;  %v1834_v28 = vpop.f32.mrf.mxu0 }
  0xe5   :  { %v566_v33 = vsel %vm548_vm1, %v2183_v23, 0.0  ;;  %v627_v34 = vmul.f32 %v2183_v23, %v2183_v23  ;;  %v2204_v48 = vadd.f32 %v1834_v28, %v2097_v22  ;;  %v671_v54 = vsel %vm548_vm1, %v629_v39, 0.0 }
  0xe6   :  { %v666_v35 = vadd.f32 %v665_v30, %v664_v26  ;;  %v567_v36 = vadd.f32 %v566_v33, %v565_v24  ;;  %v437_v37 = vpop.f32.mrf.mxu0 }
  0xe7   :  { %v667_v40 = vsel %vm548_vm1, %v627_v34, 0.0  ;;  %v2198_v41 = vadd.f32 %v2097_v22, %v437_v37  ;;  %v632_v63 = vmul.f32 %v2204_v48, %v2204_v48  ;;  %v576_v6 = vsel %vm548_vm1, %v2204_v48, 0.0 }
  0xe8   :  { %v569_v42 = vadd.f32 %v568_v38, %v567_v36  ;;  %v668_v43 = vadd.f32 %v667_v40, %v666_v35  ;;  %v1835_v45 = vpop.f32.mrf.mxu0 }
  0xe9   :  { %v630_v49 = vmul.f32 %v2198_v41, %v2198_v41  ;;  %v572_v55 = vsel %vm548_vm1, %v2198_v41, 0.0  ;;  %v2212_v56 = vadd.f32 %v1835_v45, %v2097_v22  ;;  %v677_v15 = vsel %vm548_vm1, %v632_v63, 0.0 }
  0xea   :  { %v670_v51 = vadd.f32 %v669_v46, %v668_v43  ;;  %v571_v52 = vadd.f32 %v570_v47, %v569_v42  ;;  %v440_v53 = vpop.f32.mrf.mxu0 }
  0xeb   :  { %v2215_v59 = vadd.f32 %v2097_v22, %v440_v53  ;;  %v673_v0 = vsel %vm548_vm1, %v630_v49, 0.0  ;;  %v633_v7 = vmul.f32 %v2212_v56, %v2212_v56  ;;  %v578_v16 = vsel %vm548_vm1, %v2212_v56, 0.0 }
  0xec   :  { %v573_v60 = vadd.f32 %v572_v55, %v571_v52  ;;  %v672_v61 = vadd.f32 %v671_v54, %v670_v51  ;;  %v1838_v62 = vpop.f32.mrf.mxu0 }
  0xed   :  { %v574_v1 = vsel %vm548_vm1, %v2215_v59, 0.0  ;;  %v631_v2 = vmul.f32 %v2215_v59, %v2215_v59  ;;  %v2236_v17 = vadd.f32 %v1838_v62, %v2097_v22  ;;  %v679_v26 = vsel %vm548_vm1, %v633_v7, 0.0 }
  0xee   :  { %v674_v3 = vadd.f32 %v673_v0, %v672_v61  ;;  %v575_v4 = vadd.f32 %v574_v1, %v573_v60  ;;  %v453_v5 = vpop.f32.mrf.mxu0 }
  0xef   :  { %v675_v9 = vsel %vm548_vm1, %v631_v2, 0.0  ;;  %v2230_v10 = vadd.f32 %v2097_v22, %v453_v5  ;;  %v636_v36 = vmul.f32 %v2236_v17, %v2236_v17  ;;  %v584_v45 = vsel %vm548_vm1, %v2236_v17, 0.0 }
  0xf0   :  { %v577_v11 = vadd.f32 %v576_v6, %v575_v4  ;;  %v676_v12 = vadd.f32 %v675_v9, %v674_v3  ;;  %v1839_v13 = vpop.f32.mrf.mxu0 }
  0xf1   :  { %v634_v18 = vmul.f32 %v2230_v10, %v2230_v10  ;;  %v580_v28 = vsel %vm548_vm1, %v2230_v10, 0.0  ;;  %v2244_v29 = vadd.f32 %v1839_v13, %v2097_v22  ;;  %v685_v55 = vsel %vm548_vm1, %v636_v36, 0.0 }
  0xf2   :  { %v678_v19 = vadd.f32 %v677_v15, %v676_v12  ;;  %v579_v20 = vadd.f32 %v578_v16, %v577_v11  ;;  %v456_v24 = vpop.f32.mrf.mxu0 }
  0xf3   :  { %v2247_v30 = vadd.f32 %v2097_v22, %v456_v24  ;;  %v681_v37 = vsel %vm548_vm1, %v634_v18, 0.0  ;;  %v637_v46 = vmul.f32 %v2244_v29, %v2244_v29  ;;  %v586_v60 = vsel %vm548_vm1, %v2244_v29, 0.0 }
  0xf4   :  { %v581_v33 = vadd.f32 %v580_v28, %v579_v20  ;;  %v680_v34 = vadd.f32 %v679_v26, %v678_v19  ;;  %v1842_v35 = vpop.f32.mrf.mxu0 }
  0xf5   :  { %v582_v38 = vsel %vm548_vm1, %v2247_v30, 0.0  ;;  %v635_v39 = vmul.f32 %v2247_v30, %v2247_v30  ;;  %v2265_v53 = vadd.f32 %v1842_v35, %v2097_v22  ;;  %v687_v1 = vsel %vm548_vm1, %v637_v46, 0.0 }
  0xf6   :  { %v682_v40 = vadd.f32 %v681_v37, %v680_v34  ;;  %v583_v42 = vadd.f32 %v582_v38, %v581_v33  ;;  %v469_v43 = vpop.f32.mrf.mxu0 }
  0xf7   :  { %v683_v47 = vsel %vm548_vm1, %v635_v39, 0.0  ;;  %v2262_v49 = vadd.f32 %v2097_v22, %v469_v43  ;;  %v640_v5 = vmul.f32 %v2265_v53, %v2265_v53  ;;  %v592_v20 = vsel %vm548_vm1, %v2265_v53, 0.0 }
  0xf8   :  { %v585_v51 = vadd.f32 %v584_v45, %v583_v42  ;;  %v684_v52 = vadd.f32 %v683_v47, %v682_v40  ;;  %v1843_v54 = vpop.f32.mrf.mxu0 }
  0xf9   :  { %v638_v61 = vmul.f32 %v2262_v49, %v2262_v49  ;;  %v588_v2 = vsel %vm548_vm1, %v2262_v49, 0.0  ;;  %v2276_v3 = vadd.f32 %v1843_v54, %v2097_v22  ;;  %v693_v36 = vsel %vm548_vm1, %v640_v5, 0.0 }
  0xfa   :  { %v686_v62 = vadd.f32 %v685_v55, %v684_v52  ;;  %v587_v63 = vadd.f32 %v586_v60, %v585_v51  ;;  %v472_v0 = vpop.f32.mrf.mxu0 }
  0xfb   :  { %v2279_v4 = vadd.f32 %v2097_v22, %v472_v0  ;;  %v689_v11 = vsel %vm548_vm1, %v638_v61, 0.0  ;;  %v641_v24 = vmul.f32 %v2276_v3, %v2276_v3  ;;  %v594_v37 = vsel %vm548_vm1, %v2276_v3, 0.0 }
  0xfc   :  { %v589_v6 = vadd.f32 %v588_v2, %v587_v63  ;;  %v688_v7 = vadd.f32 %v687_v1, %v686_v62  ;;  %v1846_v9 = vpop.f32.mrf.mxu0 }
  0xfd   :  { %v590_v12 = vsel %vm548_vm1, %v2279_v4, 0.0  ;;  %v639_v13 = vmul.f32 %v2279_v4, %v2279_v4  ;;  %v2289_v15 = vadd.f32 %v1846_v9, %v2097_v22  ;;  %v695_v46 = vsel %vm548_vm1, %v641_v24, 0.0 }
  0xfe   :  { %v690_v16 = vadd.f32 %v689_v11, %v688_v7  ;;  %v591_v18 = vadd.f32 %v590_v12, %v589_v6  ;;  %v485_v19 = vpop.f32.mrf.mxu0 }
  0xff   :  { %v691_v26 = vsel %vm548_vm1, %v639_v13, 0.0  ;;  %v2297_v28 = vadd.f32 %v2097_v22, %v485_v19  ;;  %v542_v38 = vmul.f32 0.0, %v2289_v15 }
 0x100   :  { %v593_v33 = vadd.f32 %v592_v20, %v591_v18  ;;  %v692_v34 = vadd.f32 %v691_v26, %v690_v16  ;;  %v1847_v35 = vpop.f32.mrf.mxu0 }
 0x101   :  { %v642_v42 = vmul.f32 %v2297_v28, %v2297_v28  ;;  %v2306_v43 = vadd.f32 %v1847_v35, %v2097_v22  ;;  %v596_v54 = vsel %vm548_vm1, %v2297_v28, 0.0  ;;  %v644_v61 = vmul.f32 %v542_v38, %v542_v38 }
 0x102   :  { %v694_v39 = vadd.f32 %v693_v36, %v692_v34  ;;  %v595_v40 = vadd.f32 %v594_v37, %v593_v33  ;;  %v488_v45 = vpop.f32.mrf.mxu0  ;;  %v600_v12 = vsel %vm548_vm1, %v542_v38, 0.0 }
 0x103   :  { %v2310_v47 = vadd.f32 %v2097_v22, %v488_v45  ;;  %v543_v55 = vmul.f32 0.0, %v2306_v43  ;;  %v697_v63 = vsel %vm548_vm1, %v642_v42, 0.0  ;;  %v701_v19 = vsel %vm548_vm1, %v644_v61, 0.0 }
 0x104   :  { %v696_v51 = vadd.f32 %v695_v46, %v694_v39  ;;  %v1850_v52 = vpop.f32.mrf.mxu0  ;;  %v597_v62 = vadd.f32 %v596_v54, %v595_v40 }
 0x105   :  { %v541_v60 = vmul.f32 0.0, %v2310_v47  ;;  %v2319_v5 = vadd.f32 %v1850_v52, %v2097_v22  ;;  %v645_v13 = vmul.f32 %v543_v55, %v543_v55  ;;  %v602_v34 = vsel %vm548_vm1, %v543_v55, 0.0 }
 0x106   :  { %v501_v0 = vpop.f32.mrf.mxu0  ;;  %v698_v7 = vadd.f32 %v697_v63, %v696_v51 }
 0x107   :  { %v598_v1 = vsel %vm548_vm1, %v541_v60, 0.0  ;;  %v643_v2 = vmul.f32 %v541_v60, %v541_v60  ;;  %v2322_v6 = vadd.f32 %v2097_v22, %v501_v0  ;;  %v546_v35 = vmul.f32 0.0, %v2319_v5 }
 0x108   :  { %v599_v9 = vadd.f32 %v598_v1, %v597_v62  ;;  %v1851_v11 = vpop.f32.mrf.mxu0  ;;  %v703_v40 = vsel %vm548_vm1, %v645_v13, 0.0 }
 0x109   :  { %v699_v16 = vsel %vm548_vm1, %v643_v2, 0.0  ;;  %v544_v18 = vmul.f32 0.0, %v2322_v6  ;;  %v2329_v26 = vadd.f32 %v1851_v11, %v2097_v22  ;;  %v648_v54 = vmul.f32 %v546_v35, %v546_v35 }
 0x10a   :  { %v601_v20 = vadd.f32 %v600_v12, %v599_v9  ;;  %v700_v24 = vadd.f32 %v699_v16, %v698_v7  ;;  %v504_v33 = vpop.f32.mrf.mxu0 }
 0x10b   :  { %v646_v36 = vmul.f32 %v544_v18, %v544_v18  ;;  %v505_v37 = vadd.f32 %v2097_v22, %v504_v33  ;;  %v604_v42 = vsel %vm548_vm1, %v544_v18, 0.0  ;;  %v547_v45 = vmul.f32 0.0, %v2329_v26 }
 0x10c   :  { %v702_v38 = vadd.f32 %v701_v19, %v700_v24  ;;  %v603_v39 = vadd.f32 %v602_v34, %v601_v20  ;;  %v608_v22 = vsel %vm548_vm1, %v546_v35, 0.0  ;;  %v709_v9 = vsel %vm548_vm1, %v648_v54, 0.0 }
 0x10d   :  { %v545_v46 = vmul.f32 0.0, %v505_v37  ;;  %v705_v60 = vsel %vm548_vm1, %v646_v36, 0.0  ;;  %v649_v0 = vmul.f32 %v547_v45, %v547_v45  ;;  %v610_v11 = vsel %vm548_vm1, %v547_v45, 0.0 }
 0x10e   :  { %v605_v51 = vadd.f32 %v604_v42, %v603_v39  ;;  %v704_v52 = vadd.f32 %v703_v40, %v702_v38 }
 0x10f   :  { %v606_v55 = vsel %vm548_vm1, %v545_v46, 0.0  ;;  %v647_v61 = vmul.f32 %v545_v46, %v545_v46  ;;  %v711_v16 = vsel %vm548_vm1, %v649_v0, 0.0 }
 0x110   :  { %v706_v62 = vadd.f32 %v705_v60, %v704_v52  ;;  %v607_v63 = vadd.f32 %v606_v55, %v605_v51  ;;  %v731_v55 = vlaneseq }
 0x111   :  { %v707_v1 = vsel %vm548_vm1, %v647_v61, 0.0 }
 0x112   :  { %v609_v2 = vadd.f32 %v608_v22, %v607_v63  ;;  %v708_v7 = vadd.f32 %v707_v1, %v706_v62  ;;  %v2345_v61 = vshrl.u32 %v731_v55, 7  ;;  %v719_v62 = vld [vmem:[%s2884_s3] sm:$0x1]  ;;  %vm1636_vm2 = vcmp.lt.s32.totalorder %v731_v55, 256 }
 0x113   :  { %v720_v1 = vld [vmem:[%s2885_s4] sm:$0x1] }
 0x114   :  { %v611_v12 = vadd.f32 %v610_v11, %v609_v2  ;;  %v710_v13 = vadd.f32 %v709_v9, %v708_v7  ;;  %v2351_v63 = vsub.s32 0, %v2345_v61 }
 0x116   :  { %v612_v18 = vrot.slane %v611_v12, 4  ;;  %v712_v19 = vadd.f32 %v711_v16, %v710_v13 }
 0x118   :  { %v613_v20 = vadd.f32 %v612_v18, %v611_v12  ;;  %v713_v24 = vrot.slane %v712_v19, 4 }
 0x11a   :  { %v614_v33 = vrot.slane %v613_v20, 2  ;;  %v714_v34 = vadd.f32 %v713_v24, %v712_v19 }
 0x11c   :  { %v615_v35 = vadd.f32 %v614_v33, %v613_v20  ;;  %v715_v36 = vrot.slane %v714_v34, 2 }
 0x11e   :  { %v616_v38 = vrot.slane %v615_v35, 1  ;;  %v716_v39 = vadd.f32 %v715_v36, %v714_v34 }
 0x120   :  { %v617_v40 = vadd.f32 %v616_v38, %v615_v35  ;;  %v717_v42 = vrot.slane %v716_v39, 1 }
 0x122   :  { %v718_v46 = vadd.f32 %v717_v42, %v716_v39  ;;  %v721_v51 = vmul.f32 0.005, %v617_v40 }
 0x124   :  { %v722_v52 = vmul.f32 0.005, %v718_v46  ;;  %v723_v45 = vmul.f32 %v721_v51, %v721_v51 }
 0x126   :  { %v724_v54 = vsub.f32 %v722_v52, %v723_v45 }
 0x128   :  { %v725_v60 = vadd.f32 1e-05, %v724_v54 }
 0x12a   :  { %1918 = vrsqrt.f32 %v725_v60 }
 0x137   :  { %v1919_v22 = vpop.eup %1918 }
 0x138   :  { %v727_v0 = vmul.f32 %v1919_v22, %v719_v62 }
 0x13a   :  { %v728_v2 = vmul.f32 %v727_v0, %v721_v51  ;;  %v2357_v7 = vrot.slane %v727_v0, %v2351_v63 }
 0x13c   :  { %v729_v9 = vsub.f32 %v720_v1, %v728_v2  ;;  %v764_v11 = vmul.f32 %v2357_v7, %v2322_v6  ;;  %v765_v12 = vmul.f32 %v2357_v7, %v505_v37  ;;  %v738_v33 = vmul.f32 %v2357_v7, %v2106_v27 }
 0x13d   :  { %v739_v34 = vmul.f32 %v2357_v7, %v2114_v31  ;;  %v766_v6 = vmul.f32 %v2357_v7, %v2319_v5  ;;  %v767_v37 = vmul.f32 %v2357_v7, %v2329_v26  ;;  %v740_v27 = vmul.f32 %v2357_v7, %v2134_v44 }
 0x13e   :  { %v2363_v13 = vrot.slane %v729_v9, %v2351_v63  ;;  %v741_v31 = vmul.f32 %v2357_v7, %v2151_v58  ;;  %v736_v5 = vmul.f32 %v2357_v7, %v2103_v25  ;;  %v737_v26 = vmul.f32 %v2357_v7, %v2117_v32 }
 0x13f   :  { %v742_v32 = vmul.f32 %v2357_v7, %v2140_v50  ;;  %v743_v0 = vmul.f32 %v2357_v7, %v2148_v57  ;;  %v744_v2 = vmul.f32 %v2357_v7, %v2166_v8  ;;  %v745_v9 = vmul.f32 %v2357_v7, %v2183_v23 }
 0x140   :  { %v802_v16 = vadd.f32 %v2363_v13, %v764_v11  ;;  %v803_v18 = vadd.f32 %v2363_v13, %v765_v12  ;;  %v776_v35 = vadd.f32 %v2363_v13, %v738_v33  ;;  %v777_v36 = vadd.f32 %v2363_v13, %v739_v34 }
 0x141   :  { %v804_v38 = vadd.f32 %v2363_v13, %v766_v6  ;;  %v805_v39 = vadd.f32 %v2363_v13, %v767_v37  ;;  %v778_v40 = vadd.f32 %v2363_v13, %v740_v27  ;;  %v779_v42 = vadd.f32 %v2363_v13, %v741_v31 }
 0x142   :  { %v834_v19 = vmax.f32 %v802_v16, 0.0  ;;  %v835_v20 = vmax.f32 %v803_v18, 0.0  ;;  %v808_v46 = vmax.f32 %v776_v35, 0.0  ;;  %v809_v51 = vmax.f32 %v777_v36, 0.0 }
 0x143   :  { %v836_v52 = vmax.f32 %v804_v38, 0.0  ;;  %v837_v45 = vmax.f32 %v805_v39, 0.0  ;;  %v774_v54 = vadd.f32 %v2363_v13, %v736_v5  ;;  %v775_v44 = vadd.f32 %v2363_v13, %v737_v26 }
 0x144   :  { %v2367_v24 = vpack.c.bf16 %v835_v20, %v834_v19  ;;  %v810_v62 = vmax.f32 %v778_v40, 0.0  ;;  %v811_v25 = vmax.f32 %v779_v42, 0.0  ;;  %v839_v1 = vpack.c.bf16 %v809_v51, %v808_v46 }
 0x145   :  { %v2393_v60 = vpack.c.bf16 %v837_v45, %v836_v52  ;;  %v806_v58 = vmax.f32 %v774_v54, 0.0  ;;  %v807_v22 = vmax.f32 %v775_v44, 0.0  ;;  %v780_v12 = vadd.f32 %v2363_v13, %v742_v32 }
 0x146   :  { %v781_v16 = vadd.f32 %v2363_v13, %v743_v0  ;;  %v782_v18 = vadd.f32 %v2363_v13, %v744_v2  ;;  %v783_v19 = vadd.f32 %v2363_v13, %v745_v9  ;;  %v840_v50 = vpack.c.bf16 %v811_v25, %v810_v62 }
 0x147   :  { %v838_v11 = vpack.c.bf16 %v807_v22, %v806_v58  ;;  %v812_v57 = vmax.f32 %v780_v12, 0.0  ;;  %v746_v33 = vmul.f32 %v2357_v7, %v2172_v14  ;;  %v747_v34 = vmul.f32 %v2357_v7, %v2180_v21 }
 0x148   :  { %v813_v8 = vmax.f32 %v781_v16, 0.0  ;;  %v814_v20 = vmax.f32 %v782_v18, 0.0  ;;  %v815_v23 = vmax.f32 %v783_v19, 0.0  ;;  %v748_v6 = vmul.f32 %v2357_v7, %v2198_v41 }
 0x149   :  { %1860 = vmatprep.mubr.msk.bf16.mxu1 %vm548_vm1, %v838_v11  ;;  %v749_v37 = vmul.f32 %v2357_v7, %v2215_v59  ;;  %v784_v35 = vadd.f32 %v2363_v13, %v746_v33  ;;  %v785_v36 = vadd.f32 %v2363_v13, %v747_v34  ;;  %v750_v59 = vmul.f32 %v2357_v7, %v2204_v48 }
 0x14a   :  { %1861 = vmatmul.mubr.msk.bf16.vlgmr.msra.gmra.mxu1 %vm548_vm1, %v839_v1  ;;  %v841_v38 = vpack.c.bf16 %v813_v8, %v812_v57  ;;  %v786_v39 = vadd.f32 %v2363_v13, %v748_v6  ;;  %v842_v31 = vpack.c.bf16 %v815_v23, %v814_v20  ;;  %v751_v26 = vmul.f32 %v2357_v7, %v2212_v56 }
 0x14b   :  { %1864 = vmatprep.mubr.msk.bf16.mxu1 %vm548_vm1, %v840_v50  ;;  %v787_v27 = vadd.f32 %v2363_v13, %v749_v37  ;;  %v816_v14 = vmax.f32 %v784_v35, 0.0  ;;  %v817_v21 = vmax.f32 %v785_v36, 0.0  ;;  %v752_v40 = vmul.f32 %v2357_v7, %v2230_v10 }
 0x14c   :  { %v818_v41 = vmax.f32 %v786_v39, 0.0  ;;  %v753_v42 = vmul.f32 %v2357_v7, %v2247_v30  ;;  %v788_v46 = vadd.f32 %v2363_v13, %v750_v59  ;;  %v789_v51 = vadd.f32 %v2363_v13, %v751_v26 }
 0x14d   :  { %v819_v5 = vmax.f32 %v787_v27, 0.0  ;;  %v843_v52 = vpack.c.bf16 %v817_v21, %v816_v14  ;;  %v790_v45 = vadd.f32 %v2363_v13, %v752_v40  ;;  %v754_v30 = vmul.f32 %v2357_v7, %v2236_v17 }
 0x14e   :  { %v791_v54 = vadd.f32 %v2363_v13, %v753_v42  ;;  %v820_v48 = vmax.f32 %v788_v46, 0.0  ;;  %v821_v56 = vmax.f32 %v789_v51, 0.0  ;;  %v755_v62 = vmul.f32 %v2357_v7, %v2244_v29 }
 0x14f   :  { %v844_v44 = vpack.c.bf16 %v819_v5, %v818_v41  ;;  %v822_v10 = vmax.f32 %v790_v45, 0.0  ;;  %v756_v25 = vmul.f32 %v2357_v7, %v2262_v49  ;;  %v757_v22 = vmul.f32 %v2357_v7, %v2279_v4 }
 0x150   :  { %v823_v58 = vmax.f32 %v791_v54, 0.0  ;;  %v792_v32 = vadd.f32 %v2363_v13, %v754_v30  ;;  %v793_v0 = vadd.f32 %v2363_v13, %v755_v62  ;;  %v845_v1 = vpack.c.bf16 %v821_v56, %v820_v48 }
 0x151   :  { %v794_v2 = vadd.f32 %v2363_v13, %v756_v25  ;;  %v795_v9 = vadd.f32 %v2363_v13, %v757_v22  ;;  %v758_v4 = vmul.f32 %v2357_v7, %v2265_v53  ;;  %v759_v16 = vmul.f32 %v2357_v7, %v2276_v3 }
 0x152   :  { %1865 = vmatmul.mubr.msk.bf16.gmra.mxu1 %vm548_vm1, %v841_v38  ;;  %v846_v11 = vpack.c.bf16 %v823_v58, %v822_v10  ;;  %v824_v17 = vmax.f32 %v792_v32, 0.0  ;;  %v825_v29 = vmax.f32 %v793_v0, 0.0  ;;  %v760_v18 = vmul.f32 %v2357_v7, %v2297_v28 }
 0x153   :  { %1868 = vmatprep.mubr.msk.bf16.mxu1 %vm548_vm1, %v842_v31  ;;  %v826_v49 = vmax.f32 %v794_v2, 0.0  ;;  %v827_v12 = vmax.f32 %v795_v9, 0.0  ;;  %v761_v19 = vmul.f32 %v2357_v7, %v2310_v47  ;;  %v796_v50 = vadd.f32 %v2363_v13, %v758_v4 }
 0x154   :  { %v797_v57 = vadd.f32 %v2363_v13, %v759_v16  ;;  %v847_v8 = vpack.c.bf16 %v825_v29, %v824_v17  ;;  %v798_v20 = vadd.f32 %v2363_v13, %v760_v18  ;;  %v762_v47 = vmul.f32 %v2357_v7, %v2289_v15 }
 0x155   :  { %v799_v23 = vadd.f32 %v2363_v13, %v761_v19  ;;  %v848_v33 = vpack.c.bf16 %v827_v12, %v826_v49  ;;  %v828_v53 = vmax.f32 %v796_v50, 0.0  ;;  %v763_v6 = vmul.f32 %v2357_v7, %v2306_v43  ;;  %v2482_v43 = vld [vmem:[%s2887_s6] ss:$0 sm:$0xff] }
 0x156   :  { %v829_v3 = vmax.f32 %v797_v57, 0.0  ;;  %v830_v28 = vmax.f32 %v798_v20, 0.0  ;;  %v800_v37 = vadd.f32 %v2363_v13, %v762_v47 }
 0x157   :  { %v831_v34 = vmax.f32 %v799_v23, 0.0  ;;  %v801_v35 = vadd.f32 %v2363_v13, %v763_v6 }
 0x158   :  { %v849_v36 = vpack.c.bf16 %v829_v3, %v828_v53  ;;  %v832_v39 = vmax.f32 %v800_v37, 0.0 }
 0x159   :  { %v850_v38 = vpack.c.bf16 %v831_v34, %v830_v28  ;;  %v833_v27 = vmax.f32 %v801_v35, 0.0 }
 0x15a   :  { %1869 = vmatmul.mubr.msk.bf16.gmra.mxu1 %vm548_vm1, %v843_v52 }
 0x15b   :  { %1872 = vmatprep.mubr.msk.bf16.mxu1 %vm548_vm1, %v844_v44  ;;  %v851_v31 = vpack.c.bf16 %v833_v27, %v832_v39 }
 0x162   :  { %1873 = vmatmul.mubr.msk.bf16.gmra.mxu1 %vm548_vm1, %v845_v1 }
 0x163   :  { %1876 = vmatprep.mubr.msk.bf16.mxu1 %vm548_vm1, %v846_v11 }
 0x16a   :  { %1877 = vmatmul.mubr.msk.bf16.gmra.mxu1 %vm548_vm1, %v847_v8 }
 0x16b   :  { %1880 = vmatprep.mubr.msk.bf16.mxu1 %vm548_vm1, %v848_v33 }
 0x172   :  { %1881 = vmatmul.mubr.msk.bf16.gmra.mxu1 %vm548_vm1, %v849_v36 }
 0x173   :  { %1884 = vmatprep.mubr.msk.bf16.mxu1 %vm548_vm1, %v850_v38 }
 0x17a   :  { %1885 = vmatmul.mubr.msk.bf16.gmra.mxu1 %vm548_vm1, %v851_v31 }
 0x17b   :  { %1888 = vmatprep.mubr.msk.bf16.mxu1 %vm548_vm1, %v2367_v24 }
 0x182   :  { %1889 = vmatmul.mubr.msk.bf16.gmra.mxu1 %vm548_vm1, %v2393_v60 }
 0x20a   :  { %v1862_v15 = vpop.f32.mrf.mxu1 }
 0x20b   :  { %v2488_v21 = vadd.f32 %v1862_v15, %v2482_v43 }
 0x20c   :  { %v975_v7 = vpop.f32.mrf.mxu1 }
 0x20d   :  { %v2485_v13 = vadd.f32 %v2482_v43, %v975_v7  ;;  %v1205_v26 = vmul.f32 %v2488_v21, %v2488_v21  ;;  %v1137_v51 = vsel %vm306_vm0, %v2488_v21, 0.0 }
 0x20e   :  { %v1863_v14 = vpop.f32.mrf.mxu1 }
 0x20f   :  { %v1203_v24 = vmul.f32 %v2485_v13, %v2485_v13  ;;  %v2493_v60 = vadd.f32 %v1863_v14, %v2482_v43  ;;  %v1134_v40 = vsel %vm306_vm0, %v2485_v13, 0.0  ;;  %v1238_v62 = vsel %vm306_vm0, %v1205_v26, 0.0 }
 0x210   :  { %v978_v41 = vpop.f32.mrf.mxu1 }
 0x211   :  { %v2496_v5 = vadd.f32 %v2482_v43, %v978_v41  ;;  %v1235_v54 = vsel %vm306_vm0, %v1203_v24, 0.0  ;;  %v1206_v44 = vmul.f32 %v2493_v60, %v2493_v60  ;;  %v1139_v25 = vsel %vm306_vm0, %v2493_v60, 0.0 }
 0x212   :  { %v1866_v59 = vpop.f32.mrf.mxu1 }
 0x213   :  { %v1135_v42 = vsel %vm306_vm0, %v2496_v5, 0.0  ;;  %v1204_v46 = vmul.f32 %v2496_v5, %v2496_v5  ;;  %v2519_v22 = vadd.f32 %v1866_v59, %v2482_v43  ;;  %v1240_v9 = vsel %vm306_vm0, %v1206_v44, 0.0 }
 0x214   :  { %v1136_v52 = vadd.f32 %v1135_v42, %v1134_v40  ;;  %v991_v45 = vpop.f32.mrf.mxu1 }
 0x215   :  { %v1236_v48 = vsel %vm306_vm0, %v1204_v46, 0.0  ;;  %v2513_v56 = vadd.f32 %v2482_v43, %v991_v45  ;;  %v1209_v16 = vmul.f32 %v2519_v22, %v2519_v22  ;;  %v1145_v23 = vsel %vm306_vm0, %v2519_v22, 0.0 }
 0x216   :  { %v1138_v10 = vadd.f32 %v1137_v51, %v1136_v52  ;;  %v1237_v58 = vadd.f32 %v1236_v48, %v1235_v54  ;;  %v1867_v30 = vpop.f32.mrf.mxu1 }
 0x217   :  { %v1207_v32 = vmul.f32 %v2513_v56, %v2513_v56  ;;  %v1141_v11 = vsel %vm306_vm0, %v2513_v56, 0.0  ;;  %v2527_v17 = vadd.f32 %v1867_v30, %v2482_v43  ;;  %v1246_v6 = vsel %vm306_vm0, %v1209_v16, 0.0 }
 0x218   :  { %v1239_v0 = vadd.f32 %v1238_v62, %v1237_v58  ;;  %v1140_v1 = vadd.f32 %v1139_v25, %v1138_v10  ;;  %v994_v2 = vpop.f32.mrf.mxu1 }
 0x219   :  { %v2530_v29 = vadd.f32 %v2482_v43, %v994_v2  ;;  %v1242_v18 = vsel %vm306_vm0, %v1207_v32, 0.0  ;;  %v1210_v33 = vmul.f32 %v2527_v17, %v2527_v17  ;;  %v1147_v37 = vsel %vm306_vm0, %v2527_v17, 0.0 }
 0x21a   :  { %v1142_v49 = vadd.f32 %v1141_v11, %v1140_v1  ;;  %v1241_v12 = vadd.f32 %v1240_v9, %v1239_v0  ;;  %v1870_v4 = vpop.f32.mrf.mxu1 }
 0x21b   :  { %v1143_v19 = vsel %vm306_vm0, %v2530_v29, 0.0  ;;  %v1208_v50 = vmul.f32 %v2530_v29, %v2530_v29  ;;  %v2551_v35 = vadd.f32 %v1870_v4, %v2482_v43  ;;  %v1248_v31 = vsel %vm306_vm0, %v1210_v33, 0.0 }
 0x21c   :  { %v1243_v57 = vadd.f32 %v1242_v18, %v1241_v12  ;;  %v1144_v8 = vadd.f32 %v1143_v19, %v1142_v49  ;;  %v1007_v20 = vpop.f32.mrf.mxu1 }
 0x21d   :  { %v1244_v53 = vsel %vm306_vm0, %v1208_v50, 0.0  ;;  %v2545_v3 = vadd.f32 %v2482_v43, %v1007_v20  ;;  %v1213_v26 = vmul.f32 %v2551_v35, %v2551_v35  ;;  %v1153_v54 = vsel %vm306_vm0, %v2551_v35, 0.0 }
 0x21e   :  { %v1146_v28 = vadd.f32 %v1145_v23, %v1144_v8  ;;  %v1245_v34 = vadd.f32 %v1244_v53, %v1243_v57  ;;  %v1871_v47 = vpop.f32.mrf.mxu1 }
 0x21f   :  { %v1211_v36 = vmul.f32 %v2545_v3, %v2545_v3  ;;  %v1149_v15 = vsel %vm306_vm0, %v2545_v3, 0.0  ;;  %v2559_v7 = vadd.f32 %v1871_v47, %v2482_v43  ;;  %v1254_v25 = vsel %vm306_vm0, %v1213_v26, 0.0 }
 0x220   :  { %v1247_v38 = vadd.f32 %v1246_v6, %v1245_v34  ;;  %v1148_v39 = vadd.f32 %v1147_v37, %v1146_v28  ;;  %v1010_v27 = vpop.f32.mrf.mxu1 }
 0x221   :  { %v2562_v14 = vadd.f32 %v2482_v43, %v1010_v27  ;;  %v1250_v40 = vsel %vm306_vm0, %v1211_v36, 0.0  ;;  %v1214_v44 = vmul.f32 %v2559_v7, %v2559_v7  ;;  %v1155_v32 = vsel %vm306_vm0, %v2559_v7, 0.0 }
 0x222   :  { %v1150_v41 = vadd.f32 %v1149_v15, %v1148_v39  ;;  %v1249_v24 = vadd.f32 %v1248_v31, %v1247_v38  ;;  %v1874_v59 = vpop.f32.mrf.mxu1 }
 0x223   :  { %v1151_v42 = vsel %vm306_vm0, %v2562_v14, 0.0  ;;  %v1212_v46 = vmul.f32 %v2562_v14, %v2562_v14  ;;  %v2583_v0 = vadd.f32 %v1874_v59, %v2482_v43  ;;  %v1256_v49 = vsel %vm306_vm0, %v1214_v44, 0.0 }
 0x224   :  { %v1251_v51 = vadd.f32 %v1250_v40, %v1249_v24  ;;  %v1152_v52 = vadd.f32 %v1151_v42, %v1150_v41  ;;  %v1023_v45 = vpop.f32.mrf.mxu1 }
 0x225   :  { %v1252_v48 = vsel %vm306_vm0, %v1212_v46, 0.0  ;;  %v2577_v10 = vadd.f32 %v2482_v43, %v1023_v45  ;;  %v1217_v57 = vmul.f32 %v2583_v0, %v2583_v0  ;;  %v1161_v34 = vsel %vm306_vm0, %v2583_v0, 0.0 }
 0x226   :  { %v1154_v58 = vadd.f32 %v1153_v54, %v1152_v52  ;;  %v1253_v30 = vadd.f32 %v1252_v48, %v1251_v51  ;;  %v1875_v62 = vpop.f32.mrf.mxu1 }
 0x227   :  { %v1215_v1 = vmul.f32 %v2577_v10, %v2577_v10  ;;  %v1157_v12 = vsel %vm306_vm0, %v2577_v10, 0.0  ;;  %v2591_v4 = vadd.f32 %v1875_v62, %v2482_v43  ;;  %v1262_v27 = vsel %vm306_vm0, %v1217_v57, 0.0 }
 0x228   :  { %v1255_v2 = vadd.f32 %v1254_v25, %v1253_v30  ;;  %v1156_v9 = vadd.f32 %v1155_v32, %v1154_v58  ;;  %v1026_v11 = vpop.f32.mrf.mxu1 }
 0x229   :  { %v2594_v16 = vadd.f32 %v2482_v43, %v1026_v11  ;;  %v1258_v8 = vsel %vm306_vm0, %v1215_v1, 0.0  ;;  %v1218_v47 = vmul.f32 %v2591_v4, %v2591_v4  ;;  %v1163_v31 = vsel %vm306_vm0, %v2591_v4, 0.0 }
 0x22a   :  { %v1158_v18 = vadd.f32 %v1157_v12, %v1156_v9  ;;  %v1257_v19 = vadd.f32 %v1256_v49, %v1255_v2  ;;  %v1878_v50 = vpop.f32.mrf.mxu1 }
 0x22b   :  { %v1159_v20 = vsel %vm306_vm0, %v2594_v16, 0.0  ;;  %v1216_v23 = vmul.f32 %v2594_v16, %v2594_v16  ;;  %v2615_v15 = vadd.f32 %v1878_v50, %v2482_v43  ;;  %v1264_v40 = vsel %vm306_vm0, %v1218_v47, 0.0 }
 0x22c   :  { %v1259_v33 = vadd.f32 %v1258_v8, %v1257_v19  ;;  %v1160_v53 = vadd.f32 %v1159_v20, %v1158_v18  ;;  %v1039_v28 = vpop.f32.mrf.mxu1 }
 0x22d   :  { %v1260_v6 = vsel %vm306_vm0, %v1216_v23, 0.0  ;;  %v2609_v37 = vadd.f32 %v2482_v43, %v1039_v28  ;;  %v1221_v44 = vmul.f32 %v2615_v15, %v2615_v15  ;;  %v1169_v1 = vsel %vm306_vm0, %v2615_v15, 0.0 }
 0x22e   :  { %v1162_v36 = vadd.f32 %v1161_v34, %v1160_v53  ;;  %v1261_v38 = vadd.f32 %v1260_v6, %v1259_v33  ;;  %v1879_v39 = vpop.f32.mrf.mxu1 }
 0x22f   :  { %v1219_v41 = vmul.f32 %v2609_v37, %v2609_v37  ;;  %v1165_v42 = vsel %vm306_vm0, %v2609_v37, 0.0  ;;  %v2623_v46 = vadd.f32 %v1879_v39, %v2482_v43  ;;  %v1270_v50 = vsel %vm306_vm0, %v1221_v44, 0.0 }
 0x230   :  { %v1263_v24 = vadd.f32 %v1262_v27, %v1261_v38  ;;  %v1164_v59 = vadd.f32 %v1163_v31, %v1162_v36  ;;  %v1042_v26 = vpop.f32.mrf.mxu1 }
 0x231   :  { %v2626_v51 = vadd.f32 %v2482_v43, %v1042_v26  ;;  %v1266_v48 = vsel %vm306_vm0, %v1219_v41, 0.0  ;;  %v1222_v2 = vmul.f32 %v2623_v46, %v2623_v46  ;;  %v1171_v57 = vsel %vm306_vm0, %v2623_v46, 0.0 }
 0x232   :  { %v1166_v52 = vadd.f32 %v1165_v42, %v1164_v59  ;;  %v1265_v45 = vadd.f32 %v1264_v40, %v1263_v24  ;;  %v1882_v54 = vpop.f32.mrf.mxu1 }
 0x233   :  { %v1167_v58 = vsel %vm306_vm0, %v2626_v51, 0.0  ;;  %v1220_v30 = vmul.f32 %v2626_v51, %v2626_v51  ;;  %v2644_v18 = vadd.f32 %v1882_v54, %v2482_v43  ;;  %v1272_v53 = vsel %vm306_vm0, %v1222_v2, 0.0 }
 0x234   :  { %v1267_v62 = vadd.f32 %v1266_v48, %v1265_v45  ;;  %v1168_v25 = vadd.f32 %v1167_v58, %v1166_v52  ;;  %v1055_v32 = vpop.f32.mrf.mxu1 }
 0x235   :  { %v1268_v9 = vsel %vm306_vm0, %v1220_v30, 0.0  ;;  %v2641_v11 = vadd.f32 %v2482_v43, %v1055_v32  ;;  %v1225_v6 = vmul.f32 %v2644_v18, %v2644_v18  ;;  %v1177_v42 = vsel %vm306_vm0, %v2644_v18, 0.0 }
 0x236   :  { %v1170_v49 = vadd.f32 %v1169_v1, %v1168_v25  ;;  %v1269_v12 = vadd.f32 %v1268_v9, %v1267_v62  ;;  %v1883_v19 = vpop.f32.mrf.mxu1 }
 0x237   :  { %v1223_v8 = vmul.f32 %v2641_v11, %v2641_v11  ;;  %v1173_v28 = vsel %vm306_vm0, %v2641_v11, 0.0  ;;  %v2655_v34 = vadd.f32 %v1883_v19, %v2482_v43  ;;  %v1278_v30 = vsel %vm306_vm0, %v1225_v6, 0.0 }
 0x238   :  { %v1271_v20 = vadd.f32 %v1270_v50, %v1269_v12  ;;  %v1172_v23 = vadd.f32 %v1171_v57, %v1170_v49  ;;  %v1058_v33 = vpop.f32.mrf.mxu1 }
 0x239   :  { %v2658_v47 = vadd.f32 %v2482_v43, %v1058_v33  ;;  %v1274_v27 = vsel %vm306_vm0, %v1223_v8, 0.0  ;;  %v1226_v52 = vmul.f32 %v2655_v34, %v2655_v34  ;;  %v1179_v62 = vsel %vm306_vm0, %v2655_v34, 0.0 }
 0x23a   :  { %v1174_v36 = vadd.f32 %v1173_v28, %v1172_v23  ;;  %v1273_v38 = vadd.f32 %v1272_v53, %v1271_v20  ;;  %v1886_v39 = vpop.f32.mrf.mxu1 }
 0x23b   :  { %v1175_v31 = vsel %vm306_vm0, %v2658_v47, 0.0  ;;  %v1224_v41 = vmul.f32 %v2658_v47, %v2658_v47  ;;  %v2668_v24 = vadd.f32 %v1886_v39, %v2482_v43  ;;  %v1280_v12 = vsel %vm306_vm0, %v1226_v52, 0.0 }
 0x23c   :  { %v1275_v59 = vadd.f32 %v1274_v27, %v1273_v38  ;;  %v1176_v26 = vadd.f32 %v1175_v31, %v1174_v36  ;;  %v1071_v40 = vpop.f32.mrf.mxu1 }
 0x23d   :  { %v1276_v45 = vsel %vm306_vm0, %v1224_v41, 0.0  ;;  %v2676_v54 = vadd.f32 %v2482_v43, %v1071_v40  ;;  %v1128_v25 = vmul.f32 0.0, %v2668_v24 }
 0x23e   :  { %v1178_v44 = vadd.f32 %v1177_v42, %v1176_v26  ;;  %v1277_v48 = vadd.f32 %v1276_v45, %v1275_v59  ;;  %v1887_v58 = vpop.f32.mrf.mxu1 }
 0x23f   :  { %v1227_v2 = vmul.f32 %v2676_v54, %v2676_v54  ;;  %v2685_v9 = vadd.f32 %v1887_v58, %v2482_v43  ;;  %v1181_v8 = vsel %vm306_vm0, %v2676_v54, 0.0  ;;  %v1229_v33 = vmul.f32 %v1128_v25, %v1128_v25 }
 0x240   :  { %v1279_v32 = vadd.f32 %v1278_v30, %v1277_v48  ;;  %v1180_v1 = vadd.f32 %v1179_v62, %v1178_v44  ;;  %v1074_v49 = vpop.f32.mrf.mxu1  ;;  %v1185_v26 = vsel %vm306_vm0, %v1128_v25, 0.0 }
 0x241   :  { %v2689_v19 = vadd.f32 %v2482_v43, %v1074_v49  ;;  %v1129_v20 = vmul.f32 0.0, %v2685_v9  ;;  %v1282_v28 = vsel %vm306_vm0, %v1227_v2, 0.0  ;;  %v1286_v45 = vsel %vm306_vm0, %v1229_v33, 0.0 }
 0x242   :  { %v1281_v50 = vadd.f32 %v1280_v12, %v1279_v32  ;;  %v1890_v57 = vpop.f32.mrf.mxu1  ;;  %v1182_v53 = vadd.f32 %v1181_v8, %v1180_v1 }
 0x243   :  { %v1127_v23 = vmul.f32 0.0, %v2689_v19  ;;  %v2698_v39 = vadd.f32 %v1890_v57, %v2482_v43  ;;  %v1230_v40 = vmul.f32 %v1129_v20, %v1129_v20  ;;  %v1187_v62 = vsel %vm306_vm0, %v1129_v20, 0.0 }
 0x244   :  { %v1087_v6 = vpop.f32.mrf.mxu1  ;;  %v1283_v31 = vadd.f32 %v1282_v28, %v1281_v50 }
 0x245   :  { %v1183_v36 = vsel %vm306_vm0, %v1127_v23, 0.0  ;;  %v1228_v38 = vmul.f32 %v1127_v23, %v1127_v23  ;;  %v2701_v27 = vadd.f32 %v2482_v43, %v1087_v6  ;;  %v1132_v32 = vmul.f32 0.0, %v2698_v39 }
 0x246   :  { %v1184_v41 = vadd.f32 %v1183_v36, %v1182_v53  ;;  %v1891_v59 = vpop.f32.mrf.mxu1  ;;  %v1288_v12 = vsel %vm306_vm0, %v1230_v40, 0.0 }
 0x247   :  { %v1284_v42 = vsel %vm306_vm0, %v1228_v38, 0.0  ;;  %v1130_v52 = vmul.f32 0.0, %v2701_v27  ;;  %v2708_v58 = vadd.f32 %v1891_v59, %v2482_v43  ;;  %v1233_v53 = vmul.f32 %v1132_v32, %v1132_v32  ;;  %v2726_v59 = vld [vmem:[%s2890_s9] sm:$0x1] }
 0x248   :  { %v1186_v44 = vadd.f32 %v1185_v26, %v1184_v41  ;;  %v1285_v48 = vadd.f32 %v1284_v42, %v1283_v31  ;;  %v1090_v30 = vpop.f32.mrf.mxu1  ;;  %v1193_v38 = vsel %vm306_vm0, %v1132_v32, 0.0  ;;  %1814 = vmatprep.mubr.msk.f32.mxu0 %vm306_vm0, %v2726_v59 }
 0x249   :  { %v1231_v1 = vmul.f32 %v1130_v52, %v1130_v52  ;;  %v2713_v25 = vadd.f32 %v2482_v43, %v1090_v30  ;;  %v1189_v50 = vsel %vm306_vm0, %v1130_v52, 0.0  ;;  %v1133_v57 = vmul.f32 0.0, %v2708_v58 }
 0x24a   :  { %v1287_v2 = vadd.f32 %v1286_v45, %v1285_v48  ;;  %v1188_v49 = vadd.f32 %v1187_v62, %v1186_v44  ;;  %v1294_v42 = vsel %vm306_vm0, %v1233_v53, 0.0  ;;  %v1424_v48 = vld [vmem:[#allocation2] sm:$0x1]  ;;  %v1952_v62 = vmov 0  }
 0x24b   :  { %v1131_v8 = vmul.f32 0.0, %v2713_v25  ;;  %v1290_v20 = vsel %vm306_vm0, %v1231_v1, 0.0  ;;  %v1234_v31 = vmul.f32 %v1133_v57, %v1133_v57  ;;  %v1195_v52 = vsel %vm306_vm0, %v1133_v57, 0.0  ;;  %1895 = vset.pattern.permute.xlu0 %v1952_v62 }
 0x24c   :  { %v1190_v23 = vadd.f32 %v1189_v50, %v1188_v49  ;;  %v1289_v33 = vadd.f32 %v1288_v12, %v1287_v2  ;;  %1427 = vperm.xlu0 %1895, %v1424_v48  }
 0x24d   :  { %v1191_v28 = vsel %vm306_vm0, %v1131_v8, 0.0  ;;  %v1232_v6 = vmul.f32 %v1131_v8, %v1131_v8  ;;  %v1296_v30 = vsel %vm306_vm0, %v1234_v31, 0.0 }
 0x24e   :  { %v1291_v43 = vadd.f32 %v1290_v20, %v1289_v33  ;;  %v1192_v36 = vadd.f32 %v1191_v28, %v1190_v23 }
 0x24f   :  { %v1292_v41 = vsel %vm306_vm0, %v1232_v6, 0.0 }
 0x250   :  { %v1194_v26 = vadd.f32 %v1193_v38, %v1192_v36  ;;  %v1293_v40 = vadd.f32 %v1292_v41, %v1291_v43 }
 0x252   :  { %v1196_v45 = vadd.f32 %v1195_v52, %v1194_v26  ;;  %v1295_v44 = vadd.f32 %v1294_v42, %v1293_v40  ;;  %v1304_v26 = vld [vmem:[%s2888_s7] sm:$0x1]  ;;  %s1954_s7 = smov [#allocation3]  }
 0x253   :  { %v1305_v52 = vld [vmem:[%s2889_s8] sm:$0x1]  ;;  %s1645_s8 = sshll.u32 %s1954_s7, 4  ;;  %s1646_s8 = int_to_ptr.vmem [resolvable:$true] %s1645_s8 }
 0x254   :  { %v1197_v32 = vrot.slane %v1196_v45, 4  ;;  %v1297_v1 = vadd.f32 %v1296_v30, %v1295_v44  ;;  %s1930_s27 = scalar_lea.vmem %s1646_s8, 32  ;;  %p1935_p1 = scmp.lt.s32.totalorder %s1646_s8, %s1646_s8 }
 0x255   :  { %p1931_p0 = scmp.ne.s32.totalorder %s1646_s8, %s1930_s27  ;;  %p1936_p2 = scmp.lt.s32.totalorder %s1930_s27, %s1930_s27 }
 0x256   :  { %v1198_v2 = vadd.f32 %v1197_v32, %v1196_v45  ;;  %v1298_v49 = vrot.slane %v1297_v1, 4 }
 0x257   :  { %p1937_p3 = por %p1936_p2, %p1935_p1 }
 0x258   :  { %v1199_v12 = vrot.slane %v1198_v2, 2  ;;  %v1299_v50 = vadd.f32 %v1298_v49, %v1297_v1 }
 0x259   :  { %p1938_p4 = pnand %p1937_p3, %p1931_p0 }
 0x25a   :  { %v1200_v8 = vadd.f32 %v1199_v12, %v1198_v2  ;;  %v1300_v23 = vrot.slane %v1299_v50, 2 }
 0x25c   :  { %v1201_v33 = vrot.slane %v1200_v8, 1  ;;  %v1301_v53 = vadd.f32 %v1300_v23, %v1299_v50 }
 0x25e   :  { %v1202_v20 = vadd.f32 %v1201_v33, %v1200_v8  ;;  %v1302_v57 = vrot.slane %v1301_v53, 1 }
 0x260   :  { %v1303_v28 = vadd.f32 %v1302_v57, %v1301_v53  ;;  %v1306_v6 = vmul.f32 0.005, %v1202_v20 }
 0x262   :  { %v1307_v43 = vmul.f32 0.005, %v1303_v28  ;;  %v1308_v36 = vmul.f32 %v1306_v6, %v1306_v6 }
 0x264   :  { %v1309_v38 = vsub.f32 %v1307_v43, %v1308_v36 }
 0x266   :  { %v1310_v31 = vadd.f32 1e-05, %v1309_v38 }
 0x268   :  { %1920 = vrsqrt.f32 %v1310_v31 }
 0x275   :  { %v1921_v41 = vpop.eup %1920 }
 0x276   :  { %v1312_v40 = vmul.f32 %v1921_v41, %v1304_v26 }
 0x278   :  { %v1313_v42 = vmul.f32 %v1312_v40, %v1306_v6  ;;  %v2740_v44 = vrot.slane %v1312_v40, %v2351_v63 }
 0x27a   :  { %v1314_v45 = vsub.f32 %v1305_v52, %v1313_v42  ;;  %v1336_v30 = vmul.f32 %v2740_v44, %v2591_v4  ;;  %v1352_v62 = vmul.f32 %v2740_v44, %v2708_v58  ;;  %v1351_v1 = vmul.f32 %v2740_v44, %v2698_v39 }
 0x27b   :  { %v1335_v12 = vmul.f32 %v2740_v44, %v2583_v0  ;;  %v1350_v8 = vmul.f32 %v2740_v44, %v2713_v25  ;;  %v1334_v39 = vmul.f32 %v2740_v44, %v2594_v16  ;;  %v1349_v0 = vmul.f32 %v2740_v44, %v2701_v27 }
 0x27c   :  { %v2743_v48 = vrot.slane %v1314_v45, %v2351_v63  ;;  %v1333_v28 = vmul.f32 %v2740_v44, %v2577_v10  ;;  %v1348_v16 = vmul.f32 %v2740_v44, %v2685_v9  ;;  %v1332_v38 = vmul.f32 %v2740_v44, %v2559_v7 }
 0x27d   :  { %v1347_v10 = vmul.f32 %v2740_v44, %v2668_v24  ;;  %v1331_v40 = vmul.f32 %v2740_v44, %v2551_v35  ;;  %v1346_v7 = vmul.f32 %v2740_v44, %v2689_v19  ;;  %v1345_v35 = vmul.f32 %v2740_v44, %v2676_v54 }
 0x27e   :  { %v1374_v32 = vadd.f32 %v2743_v48, %v1336_v30  ;;  %v1390_v2 = vadd.f32 %v2743_v48, %v1352_v62  ;;  %v1389_v49 = vadd.f32 %v2743_v48, %v1351_v1  ;;  %v1373_v23 = vadd.f32 %v2743_v48, %v1335_v12 }
 0x27f   :  { %v1388_v58 = vadd.f32 %v2743_v48, %v1350_v8  ;;  %v1372_v25 = vadd.f32 %v2743_v48, %v1334_v39  ;;  %v1387_v57 = vadd.f32 %v2743_v48, %v1349_v0  ;;  %v1371_v27 = vadd.f32 %v2743_v48, %v1333_v28 }
 0x280   :  { %v1406_v50 = vmax.f32 %v1374_v32, 0.0  ;;  %v1422_v4 = vmax.f32 %v1390_v2, 0.0  ;;  %v1421_v33 = vmax.f32 %v1389_v49, 0.0  ;;  %v1405_v53 = vmax.f32 %v1373_v23, 0.0 }
 0x281   :  { %v1420_v20 = vmax.f32 %v1388_v58, 0.0  ;;  %v1404_v6 = vmax.f32 %v1372_v25, 0.0  ;;  %v1386_v43 = vadd.f32 %v2743_v48, %v1348_v16  ;;  %v1419_v36 = vmax.f32 %v1387_v57, 0.0 }
 0x282   :  { %1782 = vmatprep.subr.msk.mxu0 %vm306_vm0, %v1422_v4  ;;  %v1370_v9 = vadd.f32 %v2743_v48, %v1332_v38  ;;  %v1403_v31 = vmax.f32 %v1371_v27, 0.0  ;;  %v1385_v41 = vadd.f32 %v2743_v48, %v1347_v10  ;;  %v1369_v24 = vadd.f32 %v2743_v48, %v1331_v40 }
 0x283   :  { %1783 = vmatpush3.xpose.msk.msra.mxu0 %vm306_vm0, %v1406_v50  ;;  %v1418_v26 = vmax.f32 %v1386_v43, 0.0  ;;  %v1384_v52 = vadd.f32 %v2743_v48, %v1346_v7  ;;  %v1330_v30 = vmul.f32 %v2740_v44, %v2562_v14  ;;  %v1383_v32 = vadd.f32 %v2743_v48, %v1345_v35 }
 0x284   :  { %1784 = vmatprep.subr.msk.mxu0 %vm306_vm0, %v1421_v33  ;;  %v1402_v42 = vmax.f32 %v1370_v9, 0.0  ;;  %v1417_v45 = vmax.f32 %v1385_v41, 0.0  ;;  %v1401_v62 = vmax.f32 %v1369_v24, 0.0  ;;  %v1329_v2 = vmul.f32 %v2740_v44, %v2545_v3 }
 0x285   :  { %v1368_v19 = vadd.f32 %v2743_v48, %v1330_v30  ;;  %v1416_v1 = vmax.f32 %v1384_v52, 0.0  ;;  %v1344_v14 = vmul.f32 %v2740_v44, %v2655_v34  ;;  %v1415_v50 = vmax.f32 %v1383_v32, 0.0 }
 0x286   :  { %v1367_v54 = vadd.f32 %v2743_v48, %v1329_v2  ;;  %v1328_v8 = vmul.f32 %v2740_v44, %v2527_v17  ;;  %v1343_v3 = vmul.f32 %v2740_v44, %v2644_v18  ;;  %v1327_v33 = vmul.f32 %v2740_v44, %v2519_v22 }
 0x287   :  { %1785 = vmatpush3.xpose.msk.msra.mxu0 %vm306_vm0, %v1405_v53  ;;  %v1400_v49 = vmax.f32 %v1368_v19, 0.0  ;;  %v1382_v12 = vadd.f32 %v2743_v48, %v1344_v14  ;;  %v1342_v17 = vmul.f32 %v2740_v44, %v2658_v47  ;;  %v1326_v53 = vmul.f32 %v2740_v44, %v2530_v29 }
 0x288   :  { %1786 = vmatprep.subr.msk.mxu0 %vm306_vm0, %v1420_v20  ;;  %v1366_v34 = vadd.f32 %v2743_v48, %v1328_v8  ;;  %v1399_v4 = vmax.f32 %v1367_v54, 0.0  ;;  %v1381_v23 = vadd.f32 %v2743_v48, %v1343_v3  ;;  %v1365_v18 = vadd.f32 %v2743_v48, %v1327_v33 }
 0x289   :  { %v1414_v58 = vmax.f32 %v1382_v12, 0.0  ;;  %v1380_v0 = vadd.f32 %v2743_v48, %v1342_v17  ;;  %v1341_v22 = vmul.f32 %v2740_v44, %v2641_v11  ;;  %v1364_v47 = vadd.f32 %v2743_v48, %v1326_v53 }
 0x28a   :  { %v1398_v39 = vmax.f32 %v1366_v34, 0.0  ;;  %v1413_v25 = vmax.f32 %v1381_v23, 0.0  ;;  %v1397_v20 = vmax.f32 %v1365_v18, 0.0  ;;  %v1325_v16 = vmul.f32 %v2740_v44, %v2513_v56 }
 0x28b   :  { %1787 = vmatpush3.xpose.msk.msra.mxu0 %vm306_vm0, %v1404_v6  ;;  %v1379_v57 = vadd.f32 %v2743_v48, %v1341_v22  ;;  %v1412_v28 = vmax.f32 %v1380_v0, 0.0  ;;  %v1340_v29 = vmul.f32 %v2740_v44, %v2623_v46  ;;  %v1396_v27 = vmax.f32 %v1364_v47, 0.0 }
 0x28c   :  { %1788 = vmatprep.subr.msk.mxu0 %vm306_vm0, %v1419_v36  ;;  %v1363_v11 = vadd.f32 %v2743_v48, %v1325_v16  ;;  %v1324_v36 = vmul.f32 %v2740_v44, %v2493_v60  ;;  %v1339_v56 = vmul.f32 %v2740_v44, %v2615_v15  ;;  %v1338_v60 = vmul.f32 %v2740_v44, %v2626_v51 }
 0x28d   :  { %v1378_v6 = vadd.f32 %v2743_v48, %v1340_v29  ;;  %v1411_v43 = vmax.f32 %v1379_v57, 0.0  ;;  %v1322_v7 = vmul.f32 %v2740_v44, %v2496_v5 }
 0x28e   :  { %v1362_v46 = vadd.f32 %v2743_v48, %v1324_v36  ;;  %v1395_v38 = vmax.f32 %v1363_v11, 0.0  ;;  %v1377_v10 = vadd.f32 %v2743_v48, %v1339_v56 }
 0x28f   :  { %1789 = vmatpush3.xpose.msk.msra.mxu0 %vm306_vm0, %v1403_v31  ;;  %v1410_v9 = vmax.f32 %v1378_v6, 0.0  ;;  %v1323_v31 = vmul.f32 %v2740_v44, %v2488_v21  ;;  %v1337_v21 = vmul.f32 %v2740_v44, %v2609_v37  ;;  %v1360_v51 = vadd.f32 %v2743_v48, %v1322_v7 }
 0x290   :  { %1790 = vmatprep.subr.msk.mxu0 %vm306_vm0, %v1418_v26  ;;  %v1394_v41 = vmax.f32 %v1362_v46, 0.0  ;;  %v1376_v26 = vadd.f32 %v2743_v48, %v1338_v60  ;;  %v1409_v40 = vmax.f32 %v1377_v10, 0.0 }
 0x291   :  { %v1361_v15 = vadd.f32 %v2743_v48, %v1323_v31  ;;  %v1392_v30 = vmax.f32 %v1360_v51, 0.0 }
 0x292   :  { %v1408_v52 = vmax.f32 %v1376_v26, 0.0 }
 0x293   :  { %1791 = vmatpush3.xpose.msk.msra.mxu0 %vm306_vm0, %v1402_v42  ;;  %v1393_v24 = vmax.f32 %v1361_v15, 0.0  ;;  %v1375_v42 = vadd.f32 %v2743_v48, %v1337_v21 }
 0x294   :  { %1792 = vmatprep.subr.msk.mxu0 %vm306_vm0, %v1417_v45  ;;  %v1321_v45 = vmul.f32 %v2740_v44, %v2485_v13 }
 0x295   :  { %v1407_v35 = vmax.f32 %v1375_v42, 0.0 }
 0x296   :  { %v1359_v5 = vadd.f32 %v2743_v48, %v1321_v45 }
 0x297   :  { %1793 = vmatpush3.xpose.msk.msra.mxu0 %vm306_vm0, %v1401_v62 }
 0x298   :  { %1794 = vmatprep.subr.msk.mxu0 %vm306_vm0, %v1416_v1  ;;  %v1391_v37 = vmax.f32 %v1359_v5, 0.0 }
 0x29b   :  { %1795 = vmatpush3.xpose.msk.msra.mxu0 %vm306_vm0, %v1400_v49 }
 0x29c   :  { %1796 = vmatprep.subr.msk.mxu0 %vm306_vm0, %v1415_v50  ;;  %v1953_v50 = vmov 1966171168  }
 0x29d   :  { %v1620_v8 = vunpack.c.l.s4 %v1953_v50 }
 0x29f   :  { %1797 = vmatpush3.xpose.msk.msra.mxu0 %vm306_vm0, %v1399_v4 }
 0x2a0   :  { %1798 = vmatprep.subr.msk.mxu0 %vm306_vm0, %v1414_v58 }
 0x2a3   :  { %1799 = vmatpush3.xpose.msk.msra.mxu0 %vm306_vm0, %v1398_v39 }
 0x2a4   :  { %1800 = vmatprep.subr.msk.mxu0 %vm306_vm0, %v1413_v25 }
 0x2a7   :  { %1801 = vmatpush3.xpose.msk.msra.mxu0 %vm306_vm0, %v1397_v20 }
 0x2a8   :  { %1802 = vmatprep.subr.msk.mxu0 %vm306_vm0, %v1412_v28 }
 0x2ab   :  { %1803 = vmatpush3.xpose.msk.msra.mxu0 %vm306_vm0, %v1396_v27 }
 0x2ac   :  { %1804 = vmatprep.subr.msk.mxu0 %vm306_vm0, %v1411_v43 }
 0x2af   :  { %1805 = vmatpush3.xpose.msk.msra.mxu0 %vm306_vm0, %v1395_v38 }
 0x2b0   :  { %1806 = vmatprep.subr.msk.mxu0 %vm306_vm0, %v1410_v9 }
 0x2b3   :  { %1807 = vmatpush3.xpose.msk.msra.mxu0 %vm306_vm0, %v1394_v41 }
 0x2b4   :  { %1808 = vmatprep.subr.msk.mxu0 %vm306_vm0, %v1409_v40 }
 0x2b7   :  { %1809 = vmatpush3.xpose.msk.msra.mxu0 %vm306_vm0, %v1393_v24 }
 0x2b8   :  { %1810 = vmatprep.subr.msk.mxu0 %vm306_vm0, %v1408_v52 }
 0x2bb   :  { %1811 = vmatpush3.xpose.msk.msra.mxu0 %vm306_vm0, %v1392_v30 }
 0x2bc   :  { %1812 = vmatprep.subr.msk.mxu0 %vm306_vm0, %v1407_v35 }
 0x2bf   :  { %1813 = vmatpush3.xpose.msk.msra.mxu0 %vm306_vm0, %v1391_v37 }
 0x2c2   :  { %1815 = vmatmul.mubr.msk.f32.vlgmr.msra.gmra.mxu0 %vm306_vm0, %v2726_v59  ;;  %v1621_v59 = vunpack.c.0.s8 %v1620_v8 }
 0x2c7   :  { %v1428_v19 = vpop.permute.xlu0 %1427 }
 0x2c8   :  { %v1433_v13 = vrot.slane %v1428_v19, %v2351_v63  ;;  %v1624_v63 = vsub.s32 %v1621_v59, %v2345_v61 }
 0x382   :  { %v1599_v44 = vpop.f32.mrf.mxu0 }
 0x383   :  { %v1600_v62 = vadd.f32 %v1599_v44, %v1433_v13 }
 0x384   :  { %v1601_v32 = vpop.f32.mrf.mxu0 }
 0x385   :  { %v1742_v1 = vmul.f32 -1.442695, %v1600_v62  ;;  %v1602_v48 = vadd.f32 %v1601_v32, %v1433_v13 }
 0x387   :  { %1922 = vpow2.f32 %v1742_v1  ;;  %v1743_v2 = vmul.f32 -1.442695, %v1602_v48 }
 0x389   :  { %1924 = vpow2.f32 %v1743_v2 }
 0x394   :  { %v1923_v14 = vpop.eup %1922 }
 0x395   :  { %v1610_v54 = vadd.f32 1.0, %v1923_v14 }
 0x396   :  { %v1925_v49 = vpop.eup %1924 }
 0x397   :  { %v1611_v12 = vadd.f32 1.0, %v1925_v49  ;;  %1926 = vrcp.f32 %v1610_v54 }
 0x399   :  { %1928 = vrcp.f32 %v1611_v12 }
 0x3a4   :  { %v1927_v3 = vpop.eup %1926 }
 0x3a6   :  { %v1929_v34 = vpop.eup %1928 }
 0x3a7   :  { %v1618_v4 = vcombine.low %v1927_v3, %v1929_v34 }
 0x3a9   :  { %v1625_v23 = vrot.slane %v1618_v4, %v1624_v63 }
 0x3ab   :  { %v1632_v58 = vrot.slane %v1625_v23, %v1624_v63 }
 0x3ad   :  { %1638 = vst.msk [vmem:[#allocation3] sm:$0x3] %vm1636_vm2, %v1632_v58 }
 0x3ae   :  { %1941 = shalt.err (!%p1938_p4)
}
 0x3af   :  { %1648 = dma.vmem_to_hbm [thread:$0]  %s1646_s8, 32, %s2892_s11, [#allocation4]  }
 0x3b0   :  { %1950 = dma.done.wait [#allocation4], 32  }
 0x3b1   :  { %1951 = vsyncadd [#allocation4], 4294967264 }
 0x3b2   :  { %1652 = vsyncpa [#allocation4], 1 }

</bundles_post_ra>
